<compile_context>
chip_gen: v6e
topology: v6e:2x2x1
jax: 0.10.0
libtpu: 0.0.40
codegen_flags: <defaults>
</compile_context>

<pallas_src>
import math
from functools import partial

import jax
import jax.numpy as jnp
from jax.experimental import pallas as pl
from jax.experimental.pallas import tpu as pltpu

NUM_HEADS = 4


def _ln(x, gb, eps=1e-5):
    # gb: (2, F) -> row 0 = gamma, row 1 = beta. Matches torch.nn.LayerNorm (eps=1e-5).
    g = gb[0:1, :]
    b = gb[1:2, :]
    mu = jnp.mean(x, axis=-1, keepdims=True)
    var = jnp.mean(jnp.square(x - mu), axis=-1, keepdims=True)
    return (x - mu) * jax.lax.rsqrt(var + eps) * g + b


def _mm(a, w_bf16):
    # MXU matmul: bf16 operands, f32 accumulation (bf16-native on v5e/v6e/v7x MXUs).
    return jnp.dot(a.astype(jnp.bfloat16), w_bf16, preferred_element_type=jnp.float32)


def attention_model_kernel(
    xin_ref, proj_w_ref, proj_b_ref, proj_ln_ref,
    q_w_ref, k_w_ref, v_w_ref, q_b_ref, k_b_ref, v_b_ref,
    attn_out_w_ref, attn_out_b_ref, ln1_ref,
    ffn_w1_ref, ffn_b1_ref, ffn_w2_ref, ffn_b2_ref, ln2_ref,
    out_w1_ref, out_b1_ref, out_ln_ref, out_w2_ref, out_b2_ref,
    head_seg_ref, head_seg_t_ref,
    o_ref,
    *, batch, seq,
):
    B, S = batch, seq
    R = xin_ref.shape[0]                    # R = B * S rows, features on lanes
    H = proj_w_ref.shape[1]
    L = ln1_ref.shape[0]
    Hn = head_seg_ref.shape[1]
    d = H // Hn
    scale = 1.0 / math.sqrt(d)

    seg = head_seg_ref[...]                 # (H, Hn) one-hot per-head lane reducer  (f32)
    seg_t = head_seg_t_ref[...]             # (Hn, H) one-hot per-head lane expander (f32)

    # ---- input norm (gamma/beta pre-folded into proj_w/proj_b on the host) + projection ----
    x = xin_ref[...]                        # (R, F) f32
    mu = jnp.mean(x, axis=-1, keepdims=True)
    var = jnp.mean(jnp.square(x - mu), axis=-1, keepdims=True)
    x = (x - mu) * jax.lax.rsqrt(var + 1e-5)
    x = _mm(x, proj_w_ref[...]) + proj_b_ref[...]
    x = jnp.maximum(_ln(x, proj_ln_ref[...]), 0.0)   # Linear -> LayerNorm -> ReLU (-> Dropout=id)

    # ---- transformer blocks ----
    # TODO(synk): if L grows beyond a few layers, convert to lax.fori_loop with dynamic
    # first-axis ref indexing (q_w_ref[l], ...) to bound vreg live ranges / compile time.
    for l in range(L):
        q = _mm(x, q_w_ref[l]) + q_b_ref[l]            # (R, H)
        k = _mm(x, k_w_ref[l]) + k_b_ref[l]
        v = _mm(x, v_w_ref[l]) + v_b_ref[l]

        # Attention over the B axis per (s, head): align the attended rows by rolling
        # the full 2-D slab along sublanes; per-head d-lane reductions via one-hot
        # matmul. All score/prob math stays f32.
        scores = []
        vs = []
        for off in range(B):
            if off == 0:
                k_off, v_off = k, v
            else:
                k_off = pltpu.roll(k, shift=off * S, axis=0)
                v_off = pltpu.roll(v, shift=off * S, axis=0)
            scores.append(
                jnp.dot(q * k_off, seg, preferred_element_type=jnp.float32) * scale)   # (R, Hn)
            vs.append(v_off)
        # TODO(synk): for large B, replace this O(B)-roll formulation with an MXU
        # batched-einsum attention path (and an S-parallel grid).

        m = scores[0]
        for off in range(1, B):
            m = jnp.maximum(m, scores[off])
        es = [jnp.exp(sc - m) for sc in scores]
        denom = es[0]
        for off in range(1, B):
            denom = denom + es[off]
        inv = pl.reciprocal(denom)                      # exact (matches torch.softmax)

        attn = jnp.zeros((R, H), jnp.float32)
        for off in range(B):
            p_exp = jnp.dot(es[off] * inv, seg_t, preferred_element_type=jnp.float32)  # (R, H)
            attn = attn + p_exp * vs[off]

        attn = _mm(attn, attn_out_w_ref[l]) + attn_out_b_ref[l]
        x = _ln(x + attn, ln1_ref[l])

        h1 = jnp.maximum(_mm(x, ffn_w1_ref[l]) + ffn_b1_ref[l], 0.0)
        f = _mm(h1, ffn_w2_ref[l]) + ffn_b2_ref[l]
        x = _ln(x + f, ln2_ref[l])

    # ---- last "time step" (x[:, -1, :]): read only the B needed rows off the slab ----
    last_rows = [x[b * S + S - 1:b * S + S, :] for b in range(B)]
    xlast = last_rows[0] if B == 1 else jnp.concatenate(last_rows, axis=0)   # (B, H)

    h = _mm(xlast, out_w1_ref[...]) + out_b1_ref[...]
    h = jnp.maximum(_ln(h, out_ln_ref[...]), 0.0)
    # Final (H/2 -> 1) projection as a VPU lane reduce (out_w2 stored as a (1, H/2) row).
    o_ref[...] = jnp.sum(h * out_w2_ref[...], axis=-1, keepdims=True) + out_b2_ref[...]


def init_params(key, input_size, hidden_size=32, num_layers=2, embedding_dim=8,
                vocab_sizes=None):
    if vocab_sizes is None:
        vocab_sizes = {'Pos': 5, 'Team': 30, 'Opp': 30, 'Pos_Opp': 150}
    H = hidden_size
    F = input_size + 4 * embedding_dim
    L = num_layers
    keys = iter(jax.random.split(key, 64))

    def kaiming(fan_in, shape):
        return jax.random.normal(next(keys), shape, jnp.float32) * math.sqrt(2.0 / fan_in)

    def xavier(shape):
        fan_in, fan_out = shape[-2], shape[-1]
        lim = math.sqrt(6.0 / (fan_in + fan_out))
        return jax.random.uniform(next(keys), shape, jnp.float32, -lim, lim)

    def ln_pack(dim):  # (2, dim): gamma=1, beta=0 (matches constant_ init)
        return jnp.stack([jnp.ones((dim,), jnp.float32), jnp.zeros((dim,), jnp.float32)])

    p = {}
    p['emb_pos'] = 0.01 * jax.random.normal(next(keys), (vocab_sizes['Pos'], embedding_dim), jnp.float32)
    p['emb_team'] = 0.01 * jax.random.normal(next(keys), (vocab_sizes['Team'], embedding_dim), jnp.float32)
    p['emb_opp'] = 0.01 * jax.random.normal(next(keys), (vocab_sizes['Opp'], embedding_dim), jnp.float32)
    p['emb_pos_opp'] = 0.01 * jax.random.normal(next(keys), (vocab_sizes['Pos_Opp'], embedding_dim), jnp.float32)

    p['ln_in'] = ln_pack(F)
    p['proj_w'] = kaiming(F, (F, H))
    p['proj_b'] = jnp.zeros((1, H), jnp.float32)
    p['proj_ln'] = ln_pack(H)

    # MultiheadAttention: separate q/k/v in-projections + out-projection, per layer
    # (already transposed for right-multiplication).
    p['attn_q_w'] = xavier((L, H, H))
    p['attn_k_w'] = xavier((L, H, H))
    p['attn_v_w'] = xavier((L, H, H))
    p['attn_q_b'] = jnp.zeros((L, 1, H), jnp.float32)
    p['attn_k_b'] = jnp.zeros((L, 1, H), jnp.float32)
    p['attn_v_b'] = jnp.zeros((L, 1, H), jnp.float32)
    p['attn_out_w'] = xavier((L, H, H))
    p['attn_out_b'] = jnp.zeros((L, 1, H), jnp.float32)

    p['ln1'] = jnp.stack([ln_pack(H)] * L)
    p['ffn_w1'] = kaiming(H, (L, H, 4 * H))
    p['ffn_b1'] = jnp.zeros((L, 1, 4 * H), jnp.float32)
    p['ffn_w2'] = kaiming(4 * H, (L, 4 * H, H))
    p['ffn_b2'] = jnp.zeros((L, 1, H), jnp.float32)
    p['ln2'] = jnp.stack([ln_pack(H)] * L)

    p['out_w1'] = kaiming(H, (H, H // 2))
    p['out_b1'] = jnp.zeros((1, H // 2), jnp.float32)
    p['out_ln'] = ln_pack(H // 2)
    p['out_w2'] = kaiming(H // 2, (1, H // 2))   # stored pre-transposed as a row vector
    p['out_b2'] = jnp.zeros((1, 1), jnp.float32)
    return p


def attention_model_forward(x, categorical_indices, params):
    # --- glue: embedding lookups + concat (gather / parameter setup outside the kernel) ---
    emb = jnp.concatenate([
        jnp.take(params['emb_pos'], categorical_indices[:, 0], axis=0),
        jnp.take(params['emb_team'], categorical_indices[:, 1], axis=0),
        jnp.take(params['emb_opp'], categorical_indices[:, 2], axis=0),
        jnp.take(params['emb_pos_opp'], categorical_indices[:, 3], axis=0),
    ], axis=1)                                             # (B, 4*emb_dim)

    if x.ndim == 2:
        x = x[:, None, :]
    B, S, _ = x.shape
    emb_b = jnp.broadcast_to(emb[:, None, :], (B, S, emb.shape[-1]))
    xin = jnp.concatenate([x, emb_b], axis=2).astype(jnp.float32)   # (B, S, F)
    F = xin.shape[-1]
    xin2d = xin.reshape(B * S, F)                                   # rows ordered (b, s)

    H = params['proj_w'].shape[1]
    Hn = NUM_HEADS
    d = H // Hn

    # Fold the input-LayerNorm affine into the projection matmul (host-side precompute):
    #   LN(x) @ W + b == norm(x) @ (diag(gamma) W) + (beta @ W + b)
    gamma = params['ln_in'][0]
    beta = params['ln_in'][1]
    proj_w = params['proj_w'] * gamma[:, None]
    proj_b = params['proj_b'] + (beta @ params['proj_w'])[None, :]

    # One-hot head-segment matrices (per-head lane reduce / broadcast via the MXU).
    seg = (jnp.arange(H)[:, None] // d == jnp.arange(Hn)[None, :]).astype(jnp.float32)  # (H, Hn)
    seg_t = seg.T                                                                        # (Hn, H)

    bf16 = lambda a: a.astype(jnp.bfloat16)     # matmul weights only; LN/bias math stays f32
    args = [
        xin2d, bf16(proj_w), proj_b, params['proj_ln'],
        bf16(params['attn_q_w']), bf16(params['attn_k_w']), bf16(params['attn_v_w']),
        params['attn_q_b'], params['attn_k_b'], params['attn_v_b'],
        bf16(params['attn_out_w']), params['attn_out_b'], params['ln1'],
        bf16(params['ffn_w1']), params['ffn_b1'], bf16(params['ffn_w2']), params['ffn_b2'],
        params['ln2'],
        bf16(params['out_w1']), params['out_b1'], params['out_ln'],
        params['out_w2'], params['out_b2'],
        seg, seg_t,
    ]
    vmem = pl.BlockSpec(memory_space=pltpu.MemorySpace.VMEM)
    # Gridless single-shot kernel: total footprint (~100 KB) is far below every chip's
    # VMEM budget; an explicit vmem_limit keeps it well-defined on v7x (64 MiB physical,
    # 32 MiB scoped default — half of v5e/v6e).
    # TODO(synk): at production sizes add an S-parallel grid (dimension_semantics=
    # ("parallel",)) — attention only mixes across B, so every s is independent; that
    # uses both v7x TensorCores and pipelines activations HBM->VMEM while weight refs
    # keep index_map -> block 0 to stay resident. Stream layers via an "arbitrary"
    # grid axis over l if the weight slab ever approaches the v7x budget.
    return pl.pallas_call(
        partial(attention_model_kernel, batch=B, seq=S),
        out_shape=jax.ShapeDtypeStruct((B, 1), jnp.float32),
        in_specs=[vmem] * len(args),
        out_specs=vmem,
        compiler_params=pltpu.CompilerParams(vmem_limit_bytes=32 * 1024 * 1024),
    )(*args)


if __name__ == "__main__":
    key = jax.random.PRNGKey(0)
    k_x, k_c, k_p = jax.random.split(key, 3)

    B, S, input_size = 2, 8, 16
    hidden_size, num_layers, embedding_dim = 32, 2, 8   # hidden divisible by 4 heads
    vocab = {'Pos': 5, 'Team': 30, 'Opp': 30, 'Pos_Opp': 150}

    x = jax.random.normal(k_x, (B, S, input_size), jnp.float32)
    maxv = jnp.array([vocab['Pos'], vocab['Team'], vocab['Opp'], vocab['Pos_Opp']], jnp.int32)
    cat = (jax.random.randint(k_c, (B, 4), 0, 1_000_000) % maxv).astype(jnp.int32)

    params = init_params(k_p, input_size, hidden_size=hidden_size,
                         num_layers=num_layers, embedding_dim=embedding_dim,
                         vocab_sizes=vocab)

    out = attention_model_forward(x, cat, params)
    out = jax.block_until_ready(out)
    assert out.shape == (B, 1), out.shape
    print("KERNEL_OK")
</pallas_src>

<mosaic_0001>
module attributes {stable_mosaic.version = 11 : i64} {
  func.func @attention_model_kernel(%arg0: memref<16x48xf32, #tpu.memory_space<vmem>>, %arg1: memref<48x32xbf16, #tpu.memory_space<vmem>>, %arg2: memref<1x32xf32, #tpu.memory_space<vmem>>, %arg3: memref<2x32xf32, #tpu.memory_space<vmem>>, %arg4: memref<2x32x32xbf16, #tpu.memory_space<vmem>>, %arg5: memref<2x32x32xbf16, #tpu.memory_space<vmem>>, %arg6: memref<2x32x32xbf16, #tpu.memory_space<vmem>>, %arg7: memref<2x1x32xf32, #tpu.memory_space<vmem>>, %arg8: memref<2x1x32xf32, #tpu.memory_space<vmem>>, %arg9: memref<2x1x32xf32, #tpu.memory_space<vmem>>, %arg10: memref<2x32x32xbf16, #tpu.memory_space<vmem>>, %arg11: memref<2x1x32xf32, #tpu.memory_space<vmem>>, %arg12: memref<2x2x32xf32, #tpu.memory_space<vmem>>, %arg13: memref<2x32x128xbf16, #tpu.memory_space<vmem>>, %arg14: memref<2x1x128xf32, #tpu.memory_space<vmem>>, %arg15: memref<2x128x32xbf16, #tpu.memory_space<vmem>>, %arg16: memref<2x1x32xf32, #tpu.memory_space<vmem>>, %arg17: memref<2x2x32xf32, #tpu.memory_space<vmem>>, %arg18: memref<32x16xbf16, #tpu.memory_space<vmem>>, %arg19: memref<1x16xf32, #tpu.memory_space<vmem>>, %arg20: memref<2x16xf32, #tpu.memory_space<vmem>>, %arg21: memref<1x16xf32, #tpu.memory_space<vmem>>, %arg22: memref<1x1xf32, #tpu.memory_space<vmem>>, %arg23: memref<32x4xf32, #tpu.memory_space<vmem>>, %arg24: memref<4x32xf32, #tpu.memory_space<vmem>>, %arg25: memref<2x1xf32, #tpu.memory_space<vmem>>) attributes {dimension_semantics = [], scalar_prefetch = 0 : i64, scratch_operands = 0 : i64, tpu.core_type = #tpu.core_type<tc>} {
    %c0 = arith.constant 0 : index
    %c0_0 = arith.constant 0 : index
    %0 = vector.load %arg23[%c0, %c0_0] : memref<32x4xf32, #tpu.memory_space<vmem>>, vector<32x4xf32>
    %c0_1 = arith.constant 0 : index
    %c0_2 = arith.constant 0 : index
    %1 = vector.load %arg24[%c0_1, %c0_2] : memref<4x32xf32, #tpu.memory_space<vmem>>, vector<4x32xf32>
    %c0_3 = arith.constant 0 : index
    %c0_4 = arith.constant 0 : index
    %2 = vector.load %arg0[%c0_3, %c0_4] : memref<16x48xf32, #tpu.memory_space<vmem>>, vector<16x48xf32>
    %cst = arith.constant dense<0.000000e+00> : vector<16xf32>
    %3 = vector.multi_reduction <add>, %2, %cst [1] : vector<16x48xf32> to vector<16xf32>
    %4 = vector.shape_cast %3 : vector<16xf32> to vector<16x1xf32>
    %cst_5 = arith.constant 4.800000e+01 : f32
    %5 = vector.broadcast %cst_5 : f32 to vector<16x1xf32>
    %6 = arith.divf %4, %5 : vector<16x1xf32>
    %7 = vector.broadcast %6 : vector<16x1xf32> to vector<16x48xf32>
    %8 = arith.subf %2, %7 : vector<16x48xf32>
    %9 = arith.mulf %8, %8 : vector<16x48xf32>
    %cst_6 = arith.constant dense<0.000000e+00> : vector<16xf32>
    %10 = vector.multi_reduction <add>, %9, %cst_6 [1] : vector<16x48xf32> to vector<16xf32>
    %11 = vector.shape_cast %10 : vector<16xf32> to vector<16x1xf32>
    %cst_7 = arith.constant 4.800000e+01 : f32
    %12 = vector.broadcast %cst_7 : f32 to vector<16x1xf32>
    %13 = arith.divf %11, %12 : vector<16x1xf32>
    %14 = vector.broadcast %6 : vector<16x1xf32> to vector<16x48xf32>
    %15 = arith.subf %2, %14 : vector<16x48xf32>
    %cst_8 = arith.constant 9.99999974E-6 : f32
    %16 = vector.broadcast %cst_8 : f32 to vector<16x1xf32>
    %17 = arith.addf %13, %16 : vector<16x1xf32>
    %18 = math.rsqrt %17 : vector<16x1xf32>
    %19 = vector.broadcast %18 : vector<16x1xf32> to vector<16x48xf32>
    %20 = arith.mulf %15, %19 : vector<16x48xf32>
    %c0_9 = arith.constant 0 : index
    %c0_10 = arith.constant 0 : index
    %21 = vector.load %arg1[%c0_9, %c0_10] : memref<48x32xbf16, #tpu.memory_space<vmem>>, vector<48x32xbf16>
    %22 = arith.truncf %20 : vector<16x48xf32> to vector<16x48xbf16>
    %cst_11 = arith.constant dense<0.000000e+00> : vector<16x32xf32>
    %23 = tpu.matmul %22, %21, %cst_11 {dimension_numbers = #tpu.dot_dimension_numbers<[1], [0], [0], [1], [0, 0, 1, 1], [], []>} : vector<16x48xbf16>, vector<48x32xbf16>, vector<16x32xf32> -> vector<16x32xf32>
    %c0_12 = arith.constant 0 : index
    %c0_13 = arith.constant 0 : index
    %24 = vector.load %arg2[%c0_12, %c0_13] : memref<1x32xf32, #tpu.memory_space<vmem>>, vector<1x32xf32>
    %25 = vector.broadcast %24 : vector<1x32xf32> to vector<16x32xf32>
    %26 = arith.addf %23, %25 : vector<16x32xf32>
    %c0_14 = arith.constant 0 : index
    %c0_15 = arith.constant 0 : index
    %27 = vector.load %arg3[%c0_14, %c0_15] : memref<2x32xf32, #tpu.memory_space<vmem>>, vector<2x32xf32>
    %28 = vector.extract_strided_slice %27 {offsets = [0, 0], sizes = [1, 32], strides = [1, 1]} : vector<2x32xf32> to vector<1x32xf32>
    %29 = vector.extract_strided_slice %27 {offsets = [1, 0], sizes = [1, 32], strides = [1, 1]} : vector<2x32xf32> to vector<1x32xf32>
    %cst_16 = arith.constant dense<0.000000e+00> : vector<16xf32>
    %30 = vector.multi_reduction <add>, %26, %cst_16 [1] : vector<16x32xf32> to vector<16xf32>
    %31 = vector.shape_cast %30 : vector<16xf32> to vector<16x1xf32>
    %cst_17 = arith.constant 3.200000e+01 : f32
    %32 = vector.broadcast %cst_17 : f32 to vector<16x1xf32>
    %33 = arith.divf %31, %32 : vector<16x1xf32>
    %34 = vector.broadcast %33 : vector<16x1xf32> to vector<16x32xf32>
    %35 = arith.subf %26, %34 : vector<16x32xf32>
    %36 = arith.mulf %35, %35 : vector<16x32xf32>
    %cst_18 = arith.constant dense<0.000000e+00> : vector<16xf32>
    %37 = vector.multi_reduction <add>, %36, %cst_18 [1] : vector<16x32xf32> to vector<16xf32>
    %38 = vector.shape_cast %37 : vector<16xf32> to vector<16x1xf32>
    %cst_19 = arith.constant 3.200000e+01 : f32
    %39 = vector.broadcast %cst_19 : f32 to vector<16x1xf32>
    %40 = arith.divf %38, %39 : vector<16x1xf32>
    %41 = vector.broadcast %33 : vector<16x1xf32> to vector<16x32xf32>
    %42 = arith.subf %26, %41 : vector<16x32xf32>
    %cst_20 = arith.constant 9.99999974E-6 : f32
    %43 = vector.broadcast %cst_20 : f32 to vector<16x1xf32>
    %44 = arith.addf %40, %43 : vector<16x1xf32>
    %45 = math.rsqrt %44 : vector<16x1xf32>
    %46 = vector.broadcast %45 : vector<16x1xf32> to vector<16x32xf32>
    %47 = arith.mulf %42, %46 : vector<16x32xf32>
    %48 = vector.broadcast %28 : vector<1x32xf32> to vector<16x32xf32>
    %49 = arith.mulf %47, %48 : vector<16x32xf32>
    %50 = vector.broadcast %29 : vector<1x32xf32> to vector<16x32xf32>
    %51 = arith.addf %49, %50 : vector<16x32xf32>
    %cst_21 = arith.constant 0.000000e+00 : f32
    %52 = vector.broadcast %cst_21 : f32 to vector<16x32xf32>
    %53 = arith.maximumf %51, %52 : vector<16x32xf32>
    %c0_22 = arith.constant 0 : index
    %c0_23 = arith.constant 0 : index
    %c0_24 = arith.constant 0 : index
    %54 = vector.load %arg4[%c0_22, %c0_23, %c0_24] : memref<2x32x32xbf16, #tpu.memory_space<vmem>>, vector<1x32x32xbf16>
    %55 = vector.shape_cast %54 : vector<1x32x32xbf16> to vector<32x32xbf16>
    %56 = arith.truncf %53 : vector<16x32xf32> to vector<16x32xbf16>
    %cst_25 = arith.constant dense<0.000000e+00> : vector<16x32xf32>
    %57 = tpu.matmul %56, %55, %cst_25 {dimension_numbers = #tpu.dot_dimension_numbers<[1], [0], [0], [1], [0, 0, 1, 1], [], []>} : vector<16x32xbf16>, vector<32x32xbf16>, vector<16x32xf32> -> vector<16x32xf32>
    %c0_26 = arith.constant 0 : index
    %c0_27 = arith.constant 0 : index
    %c0_28 = arith.constant 0 : index
    %58 = vector.load %arg7[%c0_26, %c0_27, %c0_28] : memref<2x1x32xf32, #tpu.memory_space<vmem>>, vector<1x1x32xf32>
    %59 = vector.shape_cast %58 : vector<1x1x32xf32> to vector<1x32xf32>
    %60 = vector.broadcast %59 : vector<1x32xf32> to vector<16x32xf32>
    %61 = arith.addf %57, %60 : vector<16x32xf32>
    %c0_29 = arith.constant 0 : index
    %c0_30 = arith.constant 0 : index
    %c0_31 = arith.constant 0 : index
    %62 = vector.load %arg5[%c0_29, %c0_30, %c0_31] : memref<2x32x32xbf16, #tpu.memory_space<vmem>>, vector<1x32x32xbf16>
    %63 = vector.shape_cast %62 : vector<1x32x32xbf16> to vector<32x32xbf16>
    %64 = arith.truncf %53 : vector<16x32xf32> to vector<16x32xbf16>
    %cst_32 = arith.constant dense<0.000000e+00> : vector<16x32xf32>
    %65 = tpu.matmul %64, %63, %cst_32 {dimension_numbers = #tpu.dot_dimension_numbers<[1], [0], [0], [1], [0, 0, 1, 1], [], []>} : vector<16x32xbf16>, vector<32x32xbf16>, vector<16x32xf32> -> vector<16x32xf32>
    %c0_33 = arith.constant 0 : index
    %c0_34 = arith.constant 0 : index
    %c0_35 = arith.constant 0 : index
    %66 = vector.load %arg8[%c0_33, %c0_34, %c0_35] : memref<2x1x32xf32, #tpu.memory_space<vmem>>, vector<1x1x32xf32>
    %67 = vector.shape_cast %66 : vector<1x1x32xf32> to vector<1x32xf32>
    %68 = vector.broadcast %67 : vector<1x32xf32> to vector<16x32xf32>
    %69 = arith.addf %65, %68 : vector<16x32xf32>
    %c0_36 = arith.constant 0 : index
    %c0_37 = arith.constant 0 : index
    %c0_38 = arith.constant 0 : index
    %70 = vector.load %arg6[%c0_36, %c0_37, %c0_38] : memref<2x32x32xbf16, #tpu.memory_space<vmem>>, vector<1x32x32xbf16>
    %71 = vector.shape_cast %70 : vector<1x32x32xbf16> to vector<32x32xbf16>
    %72 = arith.truncf %53 : vector<16x32xf32> to vector<16x32xbf16>
    %cst_39 = arith.constant dense<0.000000e+00> : vector<16x32xf32>
    %73 = tpu.matmul %72, %71, %cst_39 {dimension_numbers = #tpu.dot_dimension_numbers<[1], [0], [0], [1], [0, 0, 1, 1], [], []>} : vector<16x32xbf16>, vector<32x32xbf16>, vector<16x32xf32> -> vector<16x32xf32>
    %c0_40 = arith.constant 0 : index
    %c0_41 = arith.constant 0 : index
    %c0_42 = arith.constant 0 : index
    %74 = vector.load %arg9[%c0_40, %c0_41, %c0_42] : memref<2x1x32xf32, #tpu.memory_space<vmem>>, vector<1x1x32xf32>
    %75 = vector.shape_cast %74 : vector<1x1x32xf32> to vector<1x32xf32>
    %76 = vector.broadcast %75 : vector<1x32xf32> to vector<16x32xf32>
    %77 = arith.addf %73, %76 : vector<16x32xf32>
    %78 = arith.mulf %61, %69 : vector<16x32xf32>
    %cst_43 = arith.constant dense<0.000000e+00> : vector<16x4xf32>
    %79 = tpu.matmul %78, %0, %cst_43 {dimension_numbers = #tpu.dot_dimension_numbers<[1], [0], [0], [1], [0, 0, 1, 1], [], []>} : vector<16x32xf32>, vector<32x4xf32>, vector<16x4xf32> -> vector<16x4xf32>
    %cst_44 = arith.constant 0.353553385 : f32
    %80 = vector.broadcast %cst_44 : f32 to vector<16x4xf32>
    %81 = arith.mulf %79, %80 : vector<16x4xf32>
    %c8_i32 = arith.constant 8 : i32
    %82 = tpu.dynamic_rotate %69 by %c8_i32 dim 0 : vector<16x32xf32>, i32 -> vector<16x32xf32>
    %c8_i32_45 = arith.constant 8 : i32
    %83 = tpu.dynamic_rotate %77 by %c8_i32_45 dim 0 : vector<16x32xf32>, i32 -> vector<16x32xf32>
    %84 = arith.mulf %61, %82 : vector<16x32xf32>
    %cst_46 = arith.constant dense<0.000000e+00> : vector<16x4xf32>
    %85 = tpu.matmul %84, %0, %cst_46 {dimension_numbers = #tpu.dot_dimension_numbers<[1], [0], [0], [1], [0, 0, 1, 1], [], []>} : vector<16x32xf32>, vector<32x4xf32>, vector<16x4xf32> -> vector<16x4xf32>
    %cst_47 = arith.constant 0.353553385 : f32
    %86 = vector.broadcast %cst_47 : f32 to vector<16x4xf32>
    %87 = arith.mulf %85, %86 : vector<16x4xf32>
    %88 = arith.maximumf %81, %87 : vector<16x4xf32>
    %89 = arith.subf %81, %88 : vector<16x4xf32>
    %90 = math.exp %89 : vector<16x4xf32>
    %91 = arith.subf %87, %88 : vector<16x4xf32>
    %92 = math.exp %91 : vector<16x4xf32>
    %93 = arith.addf %90, %92 : vector<16x4xf32>
    %94 = tpu.reciprocal %93 : vector<16x4xf32> -> vector<16x4xf32>
    %cst_48 = arith.constant 0.000000e+00 : f32
    %95 = vector.broadcast %cst_48 : f32 to vector<16x32xf32>
    %96 = arith.mulf %90, %94 : vector<16x4xf32>
    %cst_49 = arith.constant dense<0.000000e+00> : vector<16x32xf32>
    %97 = tpu.matmul %96, %1, %cst_49 {dimension_numbers = #tpu.dot_dimension_numbers<[1], [0], [0], [1], [0, 0, 1, 1], [], []>} : vector<16x4xf32>, vector<4x32xf32>, vector<16x32xf32> -> vector<16x32xf32>
    %98 = arith.mulf %97, %77 : vector<16x32xf32>
    %99 = arith.addf %95, %98 : vector<16x32xf32>
    %100 = arith.mulf %92, %94 : vector<16x4xf32>
    %cst_50 = arith.constant dense<0.000000e+00> : vector<16x32xf32>
    %101 = tpu.matmul %100, %1, %cst_50 {dimension_numbers = #tpu.dot_dimension_numbers<[1], [0], [0], [1], [0, 0, 1, 1], [], []>} : vector<16x4xf32>, vector<4x32xf32>, vector<16x32xf32> -> vector<16x32xf32>
    %102 = arith.mulf %101, %83 : vector<16x32xf32>
    %103 = arith.addf %99, %102 : vector<16x32xf32>
    %c0_51 = arith.constant 0 : index
    %c0_52 = arith.constant 0 : index
    %c0_53 = arith.constant 0 : index
    %104 = vector.load %arg10[%c0_51, %c0_52, %c0_53] : memref<2x32x32xbf16, #tpu.memory_space<vmem>>, vector<1x32x32xbf16>
    %105 = vector.shape_cast %104 : vector<1x32x32xbf16> to vector<32x32xbf16>
    %106 = arith.truncf %103 : vector<16x32xf32> to vector<16x32xbf16>
    %cst_54 = arith.constant dense<0.000000e+00> : vector<16x32xf32>
    %107 = tpu.matmul %106, %105, %cst_54 {dimension_numbers = #tpu.dot_dimension_numbers<[1], [0], [0], [1], [0, 0, 1, 1], [], []>} : vector<16x32xbf16>, vector<32x32xbf16>, vector<16x32xf32> -> vector<16x32xf32>
    %c0_55 = arith.constant 0 : index
    %c0_56 = arith.constant 0 : index
    %c0_57 = arith.constant 0 : index
    %108 = vector.load %arg11[%c0_55, %c0_56, %c0_57] : memref<2x1x32xf32, #tpu.memory_space<vmem>>, vector<1x1x32xf32>
    %109 = vector.shape_cast %108 : vector<1x1x32xf32> to vector<1x32xf32>
    %110 = vector.broadcast %109 : vector<1x32xf32> to vector<16x32xf32>
    %111 = arith.addf %107, %110 : vector<16x32xf32>
    %112 = arith.addf %53, %111 : vector<16x32xf32>
    %c0_58 = arith.constant 0 : index
    %c0_59 = arith.constant 0 : index
    %c0_60 = arith.constant 0 : index
    %113 = vector.load %arg12[%c0_58, %c0_59, %c0_60] : memref<2x2x32xf32, #tpu.memory_space<vmem>>, vector<1x2x32xf32>
    %114 = vector.shape_cast %113 : vector<1x2x32xf32> to vector<2x32xf32>
    %115 = vector.extract_strided_slice %114 {offsets = [0, 0], sizes = [1, 32], strides = [1, 1]} : vector<2x32xf32> to vector<1x32xf32>
    %116 = vector.extract_strided_slice %114 {offsets = [1, 0], sizes = [1, 32], strides = [1, 1]} : vector<2x32xf32> to vector<1x32xf32>
    %cst_61 = arith.constant dense<0.000000e+00> : vector<16xf32>
    %117 = vector.multi_reduction <add>, %112, %cst_61 [1] : vector<16x32xf32> to vector<16xf32>
    %118 = vector.shape_cast %117 : vector<16xf32> to vector<16x1xf32>
    %cst_62 = arith.constant 3.200000e+01 : f32
    %119 = vector.broadcast %cst_62 : f32 to vector<16x1xf32>
    %120 = arith.divf %118, %119 : vector<16x1xf32>
    %121 = vector.broadcast %120 : vector<16x1xf32> to vector<16x32xf32>
    %122 = arith.subf %112, %121 : vector<16x32xf32>
    %123 = arith.mulf %122, %122 : vector<16x32xf32>
    %cst_63 = arith.constant dense<0.000000e+00> : vector<16xf32>
    %124 = vector.multi_reduction <add>, %123, %cst_63 [1] : vector<16x32xf32> to vector<16xf32>
    %125 = vector.shape_cast %124 : vector<16xf32> to vector<16x1xf32>
    %cst_64 = arith.constant 3.200000e+01 : f32
    %126 = vector.broadcast %cst_64 : f32 to vector<16x1xf32>
    %127 = arith.divf %125, %126 : vector<16x1xf32>
    %128 = vector.broadcast %120 : vector<16x1xf32> to vector<16x32xf32>
    %129 = arith.subf %112, %128 : vector<16x32xf32>
    %cst_65 = arith.constant 9.99999974E-6 : f32
    %130 = vector.broadcast %cst_65 : f32 to vector<16x1xf32>
    %131 = arith.addf %127, %130 : vector<16x1xf32>
    %132 = math.rsqrt %131 : vector<16x1xf32>
    %133 = vector.broadcast %132 : vector<16x1xf32> to vector<16x32xf32>
    %134 = arith.mulf %129, %133 : vector<16x32xf32>
    %135 = vector.broadcast %115 : vector<1x32xf32> to vector<16x32xf32>
    %136 = arith.mulf %134, %135 : vector<16x32xf32>
    %137 = vector.broadcast %116 : vector<1x32xf32> to vector<16x32xf32>
    %138 = arith.addf %136, %137 : vector<16x32xf32>
    %c0_66 = arith.constant 0 : index
    %c0_67 = arith.constant 0 : index
    %c0_68 = arith.constant 0 : index
    %139 = vector.load %arg13[%c0_66, %c0_67, %c0_68] : memref<2x32x128xbf16, #tpu.memory_space<vmem>>, vector<1x32x128xbf16>
    %140 = vector.shape_cast %139 : vector<1x32x128xbf16> to vector<32x128xbf16>
    %141 = arith.truncf %138 : vector<16x32xf32> to vector<16x32xbf16>
    %cst_69 = arith.constant dense<0.000000e+00> : vector<16x128xf32>
    %142 = tpu.matmul %141, %140, %cst_69 {dimension_numbers = #tpu.dot_dimension_numbers<[1], [0], [0], [1], [0, 0, 1, 1], [], []>} : vector<16x32xbf16>, vector<32x128xbf16>, vector<16x128xf32> -> vector<16x128xf32>
    %c0_70 = arith.constant 0 : index
    %c0_71 = arith.constant 0 : index
    %c0_72 = arith.constant 0 : index
    %143 = vector.load %arg14[%c0_70, %c0_71, %c0_72] : memref<2x1x128xf32, #tpu.memory_space<vmem>>, vector<1x1x128xf32>
    %144 = vector.shape_cast %143 : vector<1x1x128xf32> to vector<1x128xf32>
    %145 = vector.broadcast %144 : vector<1x128xf32> to vector<16x128xf32>
    %146 = arith.addf %142, %145 : vector<16x128xf32>
    %cst_73 = arith.constant 0.000000e+00 : f32
    %147 = vector.broadcast %cst_73 : f32 to vector<16x128xf32>
    %148 = arith.maximumf %146, %147 : vector<16x128xf32>
    %c0_74 = arith.constant 0 : index
    %c0_75 = arith.constant 0 : index
    %c0_76 = arith.constant 0 : index
    %149 = vector.load %arg15[%c0_74, %c0_75, %c0_76] : memref<2x128x32xbf16, #tpu.memory_space<vmem>>, vector<1x128x32xbf16>
    %150 = vector.shape_cast %149 : vector<1x128x32xbf16> to vector<128x32xbf16>
    %151 = arith.truncf %148 : vector<16x128xf32> to vector<16x128xbf16>
    %cst_77 = arith.constant dense<0.000000e+00> : vector<16x32xf32>
    %152 = tpu.matmul %151, %150, %cst_77 {dimension_numbers = #tpu.dot_dimension_numbers<[1], [0], [0], [1], [0, 0, 1, 1], [], []>} : vector<16x128xbf16>, vector<128x32xbf16>, vector<16x32xf32> -> vector<16x32xf32>
    %c0_78 = arith.constant 0 : index
    %c0_79 = arith.constant 0 : index
    %c0_80 = arith.constant 0 : index
    %153 = vector.load %arg16[%c0_78, %c0_79, %c0_80] : memref<2x1x32xf32, #tpu.memory_space<vmem>>, vector<1x1x32xf32>
    %154 = vector.shape_cast %153 : vector<1x1x32xf32> to vector<1x32xf32>
    %155 = vector.broadcast %154 : vector<1x32xf32> to vector<16x32xf32>
    %156 = arith.addf %152, %155 : vector<16x32xf32>
    %157 = arith.addf %138, %156 : vector<16x32xf32>
    %c0_81 = arith.constant 0 : index
    %c0_82 = arith.constant 0 : index
    %c0_83 = arith.constant 0 : index
    %158 = vector.load %arg17[%c0_81, %c0_82, %c0_83] : memref<2x2x32xf32, #tpu.memory_space<vmem>>, vector<1x2x32xf32>
    %159 = vector.shape_cast %158 : vector<1x2x32xf32> to vector<2x32xf32>
    %160 = vector.extract_strided_slice %159 {offsets = [0, 0], sizes = [1, 32], strides = [1, 1]} : vector<2x32xf32> to vector<1x32xf32>
    %161 = vector.extract_strided_slice %159 {offsets = [1, 0], sizes = [1, 32], strides = [1, 1]} : vector<2x32xf32> to vector<1x32xf32>
    %cst_84 = arith.constant dense<0.000000e+00> : vector<16xf32>
    %162 = vector.multi_reduction <add>, %157, %cst_84 [1] : vector<16x32xf32> to vector<16xf32>
    %163 = vector.shape_cast %162 : vector<16xf32> to vector<16x1xf32>
    %cst_85 = arith.constant 3.200000e+01 : f32
    %164 = vector.broadcast %cst_85 : f32 to vector<16x1xf32>
    %165 = arith.divf %163, %164 : vector<16x1xf32>
    %166 = vector.broadcast %165 : vector<16x1xf32> to vector<16x32xf32>
    %167 = arith.subf %157, %166 : vector<16x32xf32>
    %168 = arith.mulf %167, %167 : vector<16x32xf32>
    %cst_86 = arith.constant dense<0.000000e+00> : vector<16xf32>
    %169 = vector.multi_reduction <add>, %168, %cst_86 [1] : vector<16x32xf32> to vector<16xf32>
    %170 = vector.shape_cast %169 : vector<16xf32> to vector<16x1xf32>
    %cst_87 = arith.constant 3.200000e+01 : f32
    %171 = vector.broadcast %cst_87 : f32 to vector<16x1xf32>
    %172 = arith.divf %170, %171 : vector<16x1xf32>
    %173 = vector.broadcast %165 : vector<16x1xf32> to vector<16x32xf32>
    %174 = arith.subf %157, %173 : vector<16x32xf32>
    %cst_88 = arith.constant 9.99999974E-6 : f32
    %175 = vector.broadcast %cst_88 : f32 to vector<16x1xf32>
    %176 = arith.addf %172, %175 : vector<16x1xf32>
    %177 = math.rsqrt %176 : vector<16x1xf32>
    %178 = vector.broadcast %177 : vector<16x1xf32> to vector<16x32xf32>
    %179 = arith.mulf %174, %178 : vector<16x32xf32>
    %180 = vector.broadcast %160 : vector<1x32xf32> to vector<16x32xf32>
    %181 = arith.mulf %179, %180 : vector<16x32xf32>
    %182 = vector.broadcast %161 : vector<1x32xf32> to vector<16x32xf32>
    %183 = arith.addf %181, %182 : vector<16x32xf32>
    %c1 = arith.constant 1 : index
    %c0_89 = arith.constant 0 : index
    %c0_90 = arith.constant 0 : index
    %184 = vector.load %arg4[%c1, %c0_89, %c0_90] : memref<2x32x32xbf16, #tpu.memory_space<vmem>>, vector<1x32x32xbf16>
    %185 = vector.shape_cast %184 : vector<1x32x32xbf16> to vector<32x32xbf16>
    %186 = arith.truncf %183 : vector<16x32xf32> to vector<16x32xbf16>
    %cst_91 = arith.constant dense<0.000000e+00> : vector<16x32xf32>
    %187 = tpu.matmul %186, %185, %cst_91 {dimension_numbers = #tpu.dot_dimension_numbers<[1], [0], [0], [1], [0, 0, 1, 1], [], []>} : vector<16x32xbf16>, vector<32x32xbf16>, vector<16x32xf32> -> vector<16x32xf32>
    %c1_92 = arith.constant 1 : index
    %c0_93 = arith.constant 0 : index
    %c0_94 = arith.constant 0 : index
    %188 = vector.load %arg7[%c1_92, %c0_93, %c0_94] : memref<2x1x32xf32, #tpu.memory_space<vmem>>, vector<1x1x32xf32>
    %189 = vector.shape_cast %188 : vector<1x1x32xf32> to vector<1x32xf32>
    %190 = vector.broadcast %189 : vector<1x32xf32> to vector<16x32xf32>
    %191 = arith.addf %187, %190 : vector<16x32xf32>
    %c1_95 = arith.constant 1 : index
    %c0_96 = arith.constant 0 : index
    %c0_97 = arith.constant 0 : index
    %192 = vector.load %arg5[%c1_95, %c0_96, %c0_97] : memref<2x32x32xbf16, #tpu.memory_space<vmem>>, vector<1x32x32xbf16>
    %193 = vector.shape_cast %192 : vector<1x32x32xbf16> to vector<32x32xbf16>
    %194 = arith.truncf %183 : vector<16x32xf32> to vector<16x32xbf16>
    %cst_98 = arith.constant dense<0.000000e+00> : vector<16x32xf32>
    %195 = tpu.matmul %194, %193, %cst_98 {dimension_numbers = #tpu.dot_dimension_numbers<[1], [0], [0], [1], [0, 0, 1, 1], [], []>} : vector<16x32xbf16>, vector<32x32xbf16>, vector<16x32xf32> -> vector<16x32xf32>
    %c1_99 = arith.constant 1 : index
    %c0_100 = arith.constant 0 : index
    %c0_101 = arith.constant 0 : index
    %196 = vector.load %arg8[%c1_99, %c0_100, %c0_101] : memref<2x1x32xf32, #tpu.memory_space<vmem>>, vector<1x1x32xf32>
    %197 = vector.shape_cast %196 : vector<1x1x32xf32> to vector<1x32xf32>
    %198 = vector.broadcast %197 : vector<1x32xf32> to vector<16x32xf32>
    %199 = arith.addf %195, %198 : vector<16x32xf32>
    %c1_102 = arith.constant 1 : index
    %c0_103 = arith.constant 0 : index
    %c0_104 = arith.constant 0 : index
    %200 = vector.load %arg6[%c1_102, %c0_103, %c0_104] : memref<2x32x32xbf16, #tpu.memory_space<vmem>>, vector<1x32x32xbf16>
    %201 = vector.shape_cast %200 : vector<1x32x32xbf16> to vector<32x32xbf16>
    %202 = arith.truncf %183 : vector<16x32xf32> to vector<16x32xbf16>
    %cst_105 = arith.constant dense<0.000000e+00> : vector<16x32xf32>
    %203 = tpu.matmul %202, %201, %cst_105 {dimension_numbers = #tpu.dot_dimension_numbers<[1], [0], [0], [1], [0, 0, 1, 1], [], []>} : vector<16x32xbf16>, vector<32x32xbf16>, vector<16x32xf32> -> vector<16x32xf32>
    %c1_106 = arith.constant 1 : index
    %c0_107 = arith.constant 0 : index
    %c0_108 = arith.constant 0 : index
    %204 = vector.load %arg9[%c1_106, %c0_107, %c0_108] : memref<2x1x32xf32, #tpu.memory_space<vmem>>, vector<1x1x32xf32>
    %205 = vector.shape_cast %204 : vector<1x1x32xf32> to vector<1x32xf32>
    %206 = vector.broadcast %205 : vector<1x32xf32> to vector<16x32xf32>
    %207 = arith.addf %203, %206 : vector<16x32xf32>
    %208 = arith.mulf %191, %199 : vector<16x32xf32>
    %cst_109 = arith.constant dense<0.000000e+00> : vector<16x4xf32>
    %209 = tpu.matmul %208, %0, %cst_109 {dimension_numbers = #tpu.dot_dimension_numbers<[1], [0], [0], [1], [0, 0, 1, 1], [], []>} : vector<16x32xf32>, vector<32x4xf32>, vector<16x4xf32> -> vector<16x4xf32>
    %cst_110 = arith.constant 0.353553385 : f32
    %210 = vector.broadcast %cst_110 : f32 to vector<16x4xf32>
    %211 = arith.mulf %209, %210 : vector<16x4xf32>
    %c8_i32_111 = arith.constant 8 : i32
    %212 = tpu.dynamic_rotate %199 by %c8_i32_111 dim 0 : vector<16x32xf32>, i32 -> vector<16x32xf32>
    %c8_i32_112 = arith.constant 8 : i32
    %213 = tpu.dynamic_rotate %207 by %c8_i32_112 dim 0 : vector<16x32xf32>, i32 -> vector<16x32xf32>
    %214 = arith.mulf %191, %212 : vector<16x32xf32>
    %cst_113 = arith.constant dense<0.000000e+00> : vector<16x4xf32>
    %215 = tpu.matmul %214, %0, %cst_113 {dimension_numbers = #tpu.dot_dimension_numbers<[1], [0], [0], [1], [0, 0, 1, 1], [], []>} : vector<16x32xf32>, vector<32x4xf32>, vector<16x4xf32> -> vector<16x4xf32>
    %cst_114 = arith.constant 0.353553385 : f32
    %216 = vector.broadcast %cst_114 : f32 to vector<16x4xf32>
    %217 = arith.mulf %215, %216 : vector<16x4xf32>
    %218 = arith.maximumf %211, %217 : vector<16x4xf32>
    %219 = arith.subf %211, %218 : vector<16x4xf32>
    %220 = math.exp %219 : vector<16x4xf32>
    %221 = arith.subf %217, %218 : vector<16x4xf32>
    %222 = math.exp %221 : vector<16x4xf32>
    %223 = arith.addf %220, %222 : vector<16x4xf32>
    %224 = tpu.reciprocal %223 : vector<16x4xf32> -> vector<16x4xf32>
    %cst_115 = arith.constant 0.000000e+00 : f32
    %225 = vector.broadcast %cst_115 : f32 to vector<16x32xf32>
    %226 = arith.mulf %220, %224 : vector<16x4xf32>
    %cst_116 = arith.constant dense<0.000000e+00> : vector<16x32xf32>
    %227 = tpu.matmul %226, %1, %cst_116 {dimension_numbers = #tpu.dot_dimension_numbers<[1], [0], [0], [1], [0, 0, 1, 1], [], []>} : vector<16x4xf32>, vector<4x32xf32>, vector<16x32xf32> -> vector<16x32xf32>
    %228 = arith.mulf %227, %207 : vector<16x32xf32>
    %229 = arith.addf %225, %228 : vector<16x32xf32>
    %230 = arith.mulf %222, %224 : vector<16x4xf32>
    %cst_117 = arith.constant dense<0.000000e+00> : vector<16x32xf32>
    %231 = tpu.matmul %230, %1, %cst_117 {dimension_numbers = #tpu.dot_dimension_numbers<[1], [0], [0], [1], [0, 0, 1, 1], [], []>} : vector<16x4xf32>, vector<4x32xf32>, vector<16x32xf32> -> vector<16x32xf32>
    %232 = arith.mulf %231, %213 : vector<16x32xf32>
    %233 = arith.addf %229, %232 : vector<16x32xf32>
    %c1_118 = arith.constant 1 : index
    %c0_119 = arith.constant 0 : index
    %c0_120 = arith.constant 0 : index
    %234 = vector.load %arg10[%c1_118, %c0_119, %c0_120] : memref<2x32x32xbf16, #tpu.memory_space<vmem>>, vector<1x32x32xbf16>
    %235 = vector.shape_cast %234 : vector<1x32x32xbf16> to vector<32x32xbf16>
    %236 = arith.truncf %233 : vector<16x32xf32> to vector<16x32xbf16>
    %cst_121 = arith.constant dense<0.000000e+00> : vector<16x32xf32>
    %237 = tpu.matmul %236, %235, %cst_121 {dimension_numbers = #tpu.dot_dimension_numbers<[1], [0], [0], [1], [0, 0, 1, 1], [], []>} : vector<16x32xbf16>, vector<32x32xbf16>, vector<16x32xf32> -> vector<16x32xf32>
    %c1_122 = arith.constant 1 : index
    %c0_123 = arith.constant 0 : index
    %c0_124 = arith.constant 0 : index
    %238 = vector.load %arg11[%c1_122, %c0_123, %c0_124] : memref<2x1x32xf32, #tpu.memory_space<vmem>>, vector<1x1x32xf32>
    %239 = vector.shape_cast %238 : vector<1x1x32xf32> to vector<1x32xf32>
    %240 = vector.broadcast %239 : vector<1x32xf32> to vector<16x32xf32>
    %241 = arith.addf %237, %240 : vector<16x32xf32>
    %242 = arith.addf %183, %241 : vector<16x32xf32>
    %c1_125 = arith.constant 1 : index
    %c0_126 = arith.constant 0 : index
    %c0_127 = arith.constant 0 : index
    %243 = vector.load %arg12[%c1_125, %c0_126, %c0_127] : memref<2x2x32xf32, #tpu.memory_space<vmem>>, vector<1x2x32xf32>
    %244 = vector.shape_cast %243 : vector<1x2x32xf32> to vector<2x32xf32>
    %245 = vector.extract_strided_slice %244 {offsets = [0, 0], sizes = [1, 32], strides = [1, 1]} : vector<2x32xf32> to vector<1x32xf32>
    %246 = vector.extract_strided_slice %244 {offsets = [1, 0], sizes = [1, 32], strides = [1, 1]} : vector<2x32xf32> to vector<1x32xf32>
    %cst_128 = arith.constant dense<0.000000e+00> : vector<16xf32>
    %247 = vector.multi_reduction <add>, %242, %cst_128 [1] : vector<16x32xf32> to vector<16xf32>
    %248 = vector.shape_cast %247 : vector<16xf32> to vector<16x1xf32>
    %cst_129 = arith.constant 3.200000e+01 : f32
    %249 = vector.broadcast %cst_129 : f32 to vector<16x1xf32>
    %250 = arith.divf %248, %249 : vector<16x1xf32>
    %251 = vector.broadcast %250 : vector<16x1xf32> to vector<16x32xf32>
    %252 = arith.subf %242, %251 : vector<16x32xf32>
    %253 = arith.mulf %252, %252 : vector<16x32xf32>
    %cst_130 = arith.constant dense<0.000000e+00> : vector<16xf32>
    %254 = vector.multi_reduction <add>, %253, %cst_130 [1] : vector<16x32xf32> to vector<16xf32>
    %255 = vector.shape_cast %254 : vector<16xf32> to vector<16x1xf32>
    %cst_131 = arith.constant 3.200000e+01 : f32
    %256 = vector.broadcast %cst_131 : f32 to vector<16x1xf32>
    %257 = arith.divf %255, %256 : vector<16x1xf32>
    %258 = vector.broadcast %250 : vector<16x1xf32> to vector<16x32xf32>
    %259 = arith.subf %242, %258 : vector<16x32xf32>
    %cst_132 = arith.constant 9.99999974E-6 : f32
    %260 = vector.broadcast %cst_132 : f32 to vector<16x1xf32>
    %261 = arith.addf %257, %260 : vector<16x1xf32>
    %262 = math.rsqrt %261 : vector<16x1xf32>
    %263 = vector.broadcast %262 : vector<16x1xf32> to vector<16x32xf32>
    %264 = arith.mulf %259, %263 : vector<16x32xf32>
    %265 = vector.broadcast %245 : vector<1x32xf32> to vector<16x32xf32>
    %266 = arith.mulf %264, %265 : vector<16x32xf32>
    %267 = vector.broadcast %246 : vector<1x32xf32> to vector<16x32xf32>
    %268 = arith.addf %266, %267 : vector<16x32xf32>
    %c1_133 = arith.constant 1 : index
    %c0_134 = arith.constant 0 : index
    %c0_135 = arith.constant 0 : index
    %269 = vector.load %arg13[%c1_133, %c0_134, %c0_135] : memref<2x32x128xbf16, #tpu.memory_space<vmem>>, vector<1x32x128xbf16>
    %270 = vector.shape_cast %269 : vector<1x32x128xbf16> to vector<32x128xbf16>
    %271 = arith.truncf %268 : vector<16x32xf32> to vector<16x32xbf16>
    %cst_136 = arith.constant dense<0.000000e+00> : vector<16x128xf32>
    %272 = tpu.matmul %271, %270, %cst_136 {dimension_numbers = #tpu.dot_dimension_numbers<[1], [0], [0], [1], [0, 0, 1, 1], [], []>} : vector<16x32xbf16>, vector<32x128xbf16>, vector<16x128xf32> -> vector<16x128xf32>
    %c1_137 = arith.constant 1 : index
    %c0_138 = arith.constant 0 : index
    %c0_139 = arith.constant 0 : index
    %273 = vector.load %arg14[%c1_137, %c0_138, %c0_139] : memref<2x1x128xf32, #tpu.memory_space<vmem>>, vector<1x1x128xf32>
    %274 = vector.shape_cast %273 : vector<1x1x128xf32> to vector<1x128xf32>
    %275 = vector.broadcast %274 : vector<1x128xf32> to vector<16x128xf32>
    %276 = arith.addf %272, %275 : vector<16x128xf32>
    %cst_140 = arith.constant 0.000000e+00 : f32
    %277 = vector.broadcast %cst_140 : f32 to vector<16x128xf32>
    %278 = arith.maximumf %276, %277 : vector<16x128xf32>
    %c1_141 = arith.constant 1 : index
    %c0_142 = arith.constant 0 : index
    %c0_143 = arith.constant 0 : index
    %279 = vector.load %arg15[%c1_141, %c0_142, %c0_143] : memref<2x128x32xbf16, #tpu.memory_space<vmem>>, vector<1x128x32xbf16>
    %280 = vector.shape_cast %279 : vector<1x128x32xbf16> to vector<128x32xbf16>
    %281 = arith.truncf %278 : vector<16x128xf32> to vector<16x128xbf16>
    %cst_144 = arith.constant dense<0.000000e+00> : vector<16x32xf32>
    %282 = tpu.matmul %281, %280, %cst_144 {dimension_numbers = #tpu.dot_dimension_numbers<[1], [0], [0], [1], [0, 0, 1, 1], [], []>} : vector<16x128xbf16>, vector<128x32xbf16>, vector<16x32xf32> -> vector<16x32xf32>
    %c1_145 = arith.constant 1 : index
    %c0_146 = arith.constant 0 : index
    %c0_147 = arith.constant 0 : index
    %283 = vector.load %arg16[%c1_145, %c0_146, %c0_147] : memref<2x1x32xf32, #tpu.memory_space<vmem>>, vector<1x1x32xf32>
    %284 = vector.shape_cast %283 : vector<1x1x32xf32> to vector<1x32xf32>
    %285 = vector.broadcast %284 : vector<1x32xf32> to vector<16x32xf32>
    %286 = arith.addf %282, %285 : vector<16x32xf32>
    %287 = arith.addf %268, %286 : vector<16x32xf32>
    %c1_148 = arith.constant 1 : index
    %c0_149 = arith.constant 0 : index
    %c0_150 = arith.constant 0 : index
    %288 = vector.load %arg17[%c1_148, %c0_149, %c0_150] : memref<2x2x32xf32, #tpu.memory_space<vmem>>, vector<1x2x32xf32>
    %289 = vector.shape_cast %288 : vector<1x2x32xf32> to vector<2x32xf32>
    %290 = vector.extract_strided_slice %289 {offsets = [0, 0], sizes = [1, 32], strides = [1, 1]} : vector<2x32xf32> to vector<1x32xf32>
    %291 = vector.extract_strided_slice %289 {offsets = [1, 0], sizes = [1, 32], strides = [1, 1]} : vector<2x32xf32> to vector<1x32xf32>
    %cst_151 = arith.constant dense<0.000000e+00> : vector<16xf32>
    %292 = vector.multi_reduction <add>, %287, %cst_151 [1] : vector<16x32xf32> to vector<16xf32>
    %293 = vector.shape_cast %292 : vector<16xf32> to vector<16x1xf32>
    %cst_152 = arith.constant 3.200000e+01 : f32
    %294 = vector.broadcast %cst_152 : f32 to vector<16x1xf32>
    %295 = arith.divf %293, %294 : vector<16x1xf32>
    %296 = vector.broadcast %295 : vector<16x1xf32> to vector<16x32xf32>
    %297 = arith.subf %287, %296 : vector<16x32xf32>
    %298 = arith.mulf %297, %297 : vector<16x32xf32>
    %cst_153 = arith.constant dense<0.000000e+00> : vector<16xf32>
    %299 = vector.multi_reduction <add>, %298, %cst_153 [1] : vector<16x32xf32> to vector<16xf32>
    %300 = vector.shape_cast %299 : vector<16xf32> to vector<16x1xf32>
    %cst_154 = arith.constant 3.200000e+01 : f32
    %301 = vector.broadcast %cst_154 : f32 to vector<16x1xf32>
    %302 = arith.divf %300, %301 : vector<16x1xf32>
    %303 = vector.broadcast %295 : vector<16x1xf32> to vector<16x32xf32>
    %304 = arith.subf %287, %303 : vector<16x32xf32>
    %cst_155 = arith.constant 9.99999974E-6 : f32
    %305 = vector.broadcast %cst_155 : f32 to vector<16x1xf32>
    %306 = arith.addf %302, %305 : vector<16x1xf32>
    %307 = math.rsqrt %306 : vector<16x1xf32>
    %308 = vector.broadcast %307 : vector<16x1xf32> to vector<16x32xf32>
    %309 = arith.mulf %304, %308 : vector<16x32xf32>
    %310 = vector.broadcast %290 : vector<1x32xf32> to vector<16x32xf32>
    %311 = arith.mulf %309, %310 : vector<16x32xf32>
    %312 = vector.broadcast %291 : vector<1x32xf32> to vector<16x32xf32>
    %313 = arith.addf %311, %312 : vector<16x32xf32>
    %314 = vector.extract_strided_slice %313 {offsets = [7, 0], sizes = [1, 32], strides = [1, 1]} : vector<16x32xf32> to vector<1x32xf32>
    %315 = vector.extract_strided_slice %313 {offsets = [15, 0], sizes = [1, 32], strides = [1, 1]} : vector<16x32xf32> to vector<1x32xf32>
    %316 = tpu.concatenate %314, %315 in 0 : vector<1x32xf32>, vector<1x32xf32> -> vector<2x32xf32>
    %c0_156 = arith.constant 0 : index
    %c0_157 = arith.constant 0 : index
    %317 = vector.load %arg18[%c0_156, %c0_157] : memref<32x16xbf16, #tpu.memory_space<vmem>>, vector<32x16xbf16>
    %318 = arith.truncf %316 : vector<2x32xf32> to vector<2x32xbf16>
    %cst_158 = arith.constant dense<0.000000e+00> : vector<2x16xf32>
    %319 = tpu.matmul %318, %317, %cst_158 {dimension_numbers = #tpu.dot_dimension_numbers<[1], [0], [0], [1], [0, 0, 1, 1], [], []>} : vector<2x32xbf16>, vector<32x16xbf16>, vector<2x16xf32> -> vector<2x16xf32>
    %c0_159 = arith.constant 0 : index
    %c0_160 = arith.constant 0 : index
    %320 = vector.load %arg19[%c0_159, %c0_160] : memref<1x16xf32, #tpu.memory_space<vmem>>, vector<1x16xf32>
    %321 = vector.broadcast %320 : vector<1x16xf32> to vector<2x16xf32>
    %322 = arith.addf %319, %321 : vector<2x16xf32>
    %c0_161 = arith.constant 0 : index
    %c0_162 = arith.constant 0 : index
    %323 = vector.load %arg20[%c0_161, %c0_162] : memref<2x16xf32, #tpu.memory_space<vmem>>, vector<2x16xf32>
    %324 = vector.extract_strided_slice %323 {offsets = [0, 0], sizes = [1, 16], strides = [1, 1]} : vector<2x16xf32> to vector<1x16xf32>
    %325 = vector.extract_strided_slice %323 {offsets = [1, 0], sizes = [1, 16], strides = [1, 1]} : vector<2x16xf32> to vector<1x16xf32>
    %cst_163 = arith.constant dense<0.000000e+00> : vector<2xf32>
    %326 = vector.multi_reduction <add>, %322, %cst_163 [1] : vector<2x16xf32> to vector<2xf32>
    %327 = vector.shape_cast %326 : vector<2xf32> to vector<2x1xf32>
    %cst_164 = arith.constant 1.600000e+01 : f32
    %328 = vector.broadcast %cst_164 : f32 to vector<2x1xf32>
    %329 = arith.divf %327, %328 : vector<2x1xf32>
    %330 = vector.broadcast %329 : vector<2x1xf32> to vector<2x16xf32>
    %331 = arith.subf %322, %330 : vector<2x16xf32>
    %332 = arith.mulf %331, %331 : vector<2x16xf32>
    %cst_165 = arith.constant dense<0.000000e+00> : vector<2xf32>
    %333 = vector.multi_reduction <add>, %332, %cst_165 [1] : vector<2x16xf32> to vector<2xf32>
    %334 = vector.shape_cast %333 : vector<2xf32> to vector<2x1xf32>
    %cst_166 = arith.constant 1.600000e+01 : f32
    %335 = vector.broadcast %cst_166 : f32 to vector<2x1xf32>
    %336 = arith.divf %334, %335 : vector<2x1xf32>
    %337 = vector.broadcast %329 : vector<2x1xf32> to vector<2x16xf32>
    %338 = arith.subf %322, %337 : vector<2x16xf32>
    %cst_167 = arith.constant 9.99999974E-6 : f32
    %339 = vector.broadcast %cst_167 : f32 to vector<2x1xf32>
    %340 = arith.addf %336, %339 : vector<2x1xf32>
    %341 = math.rsqrt %340 : vector<2x1xf32>
    %342 = vector.broadcast %341 : vector<2x1xf32> to vector<2x16xf32>
    %343 = arith.mulf %338, %342 : vector<2x16xf32>
    %344 = vector.broadcast %324 : vector<1x16xf32> to vector<2x16xf32>
    %345 = arith.mulf %343, %344 : vector<2x16xf32>
    %346 = vector.broadcast %325 : vector<1x16xf32> to vector<2x16xf32>
    %347 = arith.addf %345, %346 : vector<2x16xf32>
    %cst_168 = arith.constant 0.000000e+00 : f32
    %348 = vector.broadcast %cst_168 : f32 to vector<2x16xf32>
    %349 = arith.maximumf %347, %348 : vector<2x16xf32>
    %c0_169 = arith.constant 0 : index
    %c0_170 = arith.constant 0 : index
    %350 = vector.load %arg21[%c0_169, %c0_170] : memref<1x16xf32, #tpu.memory_space<vmem>>, vector<1x16xf32>
    %351 = vector.broadcast %350 : vector<1x16xf32> to vector<2x16xf32>
    %352 = arith.mulf %349, %351 : vector<2x16xf32>
    %cst_171 = arith.constant dense<0.000000e+00> : vector<2xf32>
    %353 = vector.multi_reduction <add>, %352, %cst_171 [1] : vector<2x16xf32> to vector<2xf32>
    %354 = vector.shape_cast %353 : vector<2xf32> to vector<2x1xf32>
    %c0_172 = arith.constant 0 : index
    %c0_173 = arith.constant 0 : index
    %355 = vector.load %arg22[%c0_172, %c0_173] : memref<1x1xf32, #tpu.memory_space<vmem>>, vector<1x1xf32>
    %356 = vector.broadcast %355 : vector<1x1xf32> to vector<2x1xf32>
    %357 = arith.addf %354, %356 : vector<2x1xf32>
    %c0_174 = arith.constant 0 : index
    %c0_175 = arith.constant 0 : index
    %358 = vector.load %arg25[%c0_174, %c0_175] : memref<2x1xf32, #tpu.memory_space<vmem>>, vector<2x1xf32>
    tpu.vector_store %arg25[%c0_174, %c0_175], %357 {strides = array<i32>} : memref<2x1xf32, #tpu.memory_space<vmem>>, vector<2x1xf32>,
    return
  }
}

</mosaic_0001>

<bundles_post_ra>
// kernel: tpu_custom_call.1
= control target key start
LH: loop header
LB: loop body
LE: loop exit
PB: predicated region body
PF: predicated region fallthrough
CT: control target
= control target key end

     0   :  { %vm90_vm0 = vcmask 392192   ;;  %v2684_v14 = vmov 0.0   ;;  %vm2685_vm1 = vmmov 0   ;;  %vm195_vm2 = vcmask 261120   ;;  %s3255_s0 = inlined_call_operand.vmem [shape: f32[16,48], index: 0, kind: input, shape index: {}]   ;;  %s3256_s1 = inlined_call_operand.vmem [shape: bf16[48,32], index: 1, kind: input, shape index: {}]   ;;  %s3257_s2 = inlined_call_operand.vmem [shape: f32[1,32], index: 2, kind: input, shape index: {}]   ;;  %s3258_s4 = inlined_call_operand.vmem [shape: bf16[2,32,32], index: 4, kind: input, shape index: {}]   ;;  %s3259_s5 = inlined_call_operand.vmem [shape: bf16[2,32,32], index: 5, kind: input, shape index: {}]   ;;  %s3260_s6 = inlined_call_operand.vmem [shape: bf16[2,32,32], index: 6, kind: input, shape index: {}]   ;;  %s3261_s3 = inlined_call_operand.vmem [shape: f32[2,32], index: 3, kind: input, shape index: {}]   ;;  %s3262_s23 = inlined_call_operand.vmem [shape: f32[32,4], index: 23, kind: input, shape index: {}]   ;;  %s3263_s7 = inlined_call_operand.vmem [shape: f32[2,1,32], index: 7, kind: input, shape index: {}]   ;;  %s3264_s8 = inlined_call_operand.vmem [shape: f32[2,1,32], index: 8, kind: input, shape index: {}]   ;;  %s3265_s24 = inlined_call_operand.vmem [shape: f32[4,32], index: 24, kind: input, shape index: {}]   ;;  %s3266_s10 = inlined_call_operand.vmem [shape: bf16[2,32,32], index: 10, kind: input, shape index: {}]   ;;  %s3267_s9 = inlined_call_operand.vmem [shape: f32[2,1,32], index: 9, kind: input, shape index: {}]   ;;  %s3268_s11 = inlined_call_operand.vmem [shape: f32[2,1,32], index: 11, kind: input, shape index: {}]   ;;  %s3269_s13 = inlined_call_operand.vmem [shape: bf16[2,32,128], index: 13, kind: input, shape index: {}]   ;;  %s3270_s15 = inlined_call_operand.vmem [shape: bf16[2,128,32], index: 15, kind: input, shape index: {}]   ;;  %s3271_s12 = inlined_call_operand.vmem [shape: f32[2,2,32], index: 12, kind: input, shape index: {}]   ;;  %s3272_s14 = inlined_call_operand.vmem [shape: f32[2,1,128], index: 14, kind: input, shape index: {}]   ;;  %s3273_s16 = inlined_call_operand.vmem [shape: f32[2,1,32], index: 16, kind: input, shape index: {}]   ;;  %s3274_s17 = inlined_call_operand.vmem [shape: f32[2,2,32], index: 17, kind: input, shape index: {}]   ;;  %s3275_s18 = inlined_call_operand.vmem [shape: bf16[32,16], index: 18, kind: input, shape index: {}]   ;;  %s3276_s19 = inlined_call_operand.vmem [shape: f32[1,16], index: 19, kind: input, shape index: {}]   ;;  %s3277_s22 = inlined_call_operand.<no memory space> [shape: f32[1,1], index: 22, kind: input, shape index: {}]   ;;  %s3278_s20 = inlined_call_operand.vmem [shape: f32[2,16], index: 20, kind: input, shape index: {}]   ;;  %s3279_s21 = inlined_call_operand.vmem [shape: f32[1,16], index: 21, kind: input, shape index: {}]   ;;  %s3280_s25 = inlined_call_operand.vmem [shape: f32[2,1], index: 25, kind: output, shape index: {}]  }
   0x1   :  { %3289 = sst [smem:[#allocation3_spill]] %s3255_s0  ;;  %2389 = vmatprep.subr.bf16.mxu0 %v2684_v14  ;;  %2395 = vmatprep.mubr.msk.bf16.mxu0 %vm2685_vm1, %v2684_v14  ;;  %v223_v57 = vlaneseq  ;;  %vm630_vm3 = vcmask 1043456   ;;  %vm623_vm4 = vcmask 31744   ;;  %vm2044_vm5 = vcmask 1040384  }
   0x2   :  { %3290 = sst [smem:[#allocation4_spill]] %s3256_s1  ;;  %2407 = vmatprep.subr.bf16.mxu1 %v2684_v14  ;;  %2411 = vmatprep.mubr.msk.bf16.mxu1 %vm2685_vm1, %v2684_v14  ;;  %vm2114_vm6 = vcmask 123904   ;;  %vm2159_vm7 = vcmask 1024  }
   0x3   :  { %3291 = sst [smem:[#allocation5_spill]] %s3257_s2  ;;  %v224_v59 = vshrl.u32 %v223_v57, 7 }
   0x4   :  { %3292 = sst [smem:[#allocation6_spill]] %s3258_s4 }
   0x5   :  { %3293 = sst [smem:[#allocation7_spill]] %s3259_s5  ;;  %v2869_v60 = vsub.s32 0, %v224_v59  ;;  %v2875_v63 = vsub.s32 1, %v224_v59 }
   0x6   :  { %3294 = sst [smem:[#allocation8_spill]] %s3260_s6 }
   0x7   :  { %3295 = sst [smem:[#allocation9_spill]] %s3261_s3 }
   0x8   :  { %3296 = sst [smem:[#allocation10_spill]] %s3262_s23 }
   0x9   :  { %3297 = sst [smem:[#allocation11_spill]] %s3263_s7 }
   0xa   :  { %3298 = sst [smem:[#allocation12_spill]] %s3264_s8 }
   0xb   :  { %s3299_s3 = sld [smem:[#allocation3_spill]] }
   0xc   :  { %s3300_s1 = sld [smem:[#allocation4_spill]] }
   0xd   :  { %s3301_s0 = sld [smem:[#allocation5_spill]] }
   0xe   :  { %s3303_s4 = sld [smem:[#allocation7_spill]] }
   0xf   :  { %s3304_s8 = sld [smem:[#allocation9_spill]] }
  0x10   :  { %s3305_s29 = sld [smem:[#allocation8_spill]] }
  0x11   :  { %v88_v0 = vld [vmem:[%s3299_s3] sm:$0xff]  ;;  %v89_v1 = vld [vmem:[%s3299_s3 + $0x8] sm:$0xff]  ;;  %s3302_s3 = sld [smem:[#allocation6_spill]] }
  0x12   :  { %v91_v2 = vsel %vm90_vm0, %v88_v0, 0.0  ;;  %v94_v3 = vsel %vm90_vm0, %v89_v1, 0.0  ;;  %v2593_v15 = vld [vmem:[%s3300_s1 + $0x10] sm:$0xff]   ;;  %v2594_v16 = vld [vmem:[%s3300_s1 + $0x8] sm:$0xff]   ;;  %v2595_v17 = vld [vmem:[%s3300_s1] sm:$0xff]   ;;  %s3306_s1 = sld [smem:[#allocation10_spill]] }
  0x13   :  { %92 = vadd.xlane.f32.xlu0 %v91_v2  ;;  %2390 = vmatpush3.bf16.msra.mxu0 %v2593_v15  ;;  %v2165_v29 = vld [vmem:[%s3301_s0] ss:$0 sm:$0xff]  ;;  %s3307_s30 = sld [smem:[#allocation11_spill]] }
  0x14   :  { %2391 = vmatprep.subr.bf16.mxu0 %v2684_v14  ;;  %v2597_v49 = vld [vmem:[%s3303_s4 + $0x8] sm:$0xff]   ;;  %v2599_v51 = vld [vmem:[%s3303_s4] sm:$0xff]   ;;  %s3308_s7 = sld [smem:[#allocation12_spill]] }
  0x15   :  { %2408 = vmatpush3.bf16.msra.mxu1 %v2597_v49  ;;  %v194_v61 = vld [vmem:[%s3304_s8] sm:$0x3] }
  0x16   :  { %2409 = vmatprep.subr.bf16.mxu1 %v2684_v14  ;;  %v226_v62 = vrot.slane %v194_v61, %v2869_v60 }
  0x17   :  { %95 = vadd.xlane.f32.xlu0 %v94_v3  ;;  %2392 = vmatpush3.bf16.msra.mxu0 %v2594_v16  ;;  %v2596_v48 = vld [vmem:[%s3302_s3 + $0x8] sm:$0xff]   ;;  %v2598_v50 = vld [vmem:[%s3302_s3] sm:$0xff]   ;;  %v232_v3 = vrot.slane %v194_v61, %v2875_v63 }
  0x18   :  { %2393 = vmatprep.subr.bf16.mxu0 %v2684_v14  ;;  %v2903_v15 = vld [vmem:[%s3306_s1 + $0x18] sm:$0xff]  ;;  %v2912_v16 = vld [vmem:[%s3306_s1 + $0x10] sm:$0xff] }
  0x19   :  { %2410 = vmatpush3.bf16.msra.mxu1 %v2599_v51 }
  0x1a   :  { %2423 = vmatprep.subr.mxu1 %v2903_v15 }
  0x1b   :  { %2394 = vmatpush3.bf16.msra.mxu0 %v2595_v17  ;;  %v2921_v17 = vld [vmem:[%s3306_s1 + $0x8] sm:$0xff] }
  0x1c   :  { %2399 = vmatprep.subr.bf16.mxu0 %v2684_v14 }
  0x9c   :  { %v93_v4 = vpop.xlane.xlu0 %92 }
  0x9d   :  { %v98_v5 = vmul.f32 0.020833334, %v93_v4 }
  0x9f   :  { %v100_v6 = vsub.f32 %v88_v0, %v98_v5 }
  0xa0   :  { %v96_v7 = vpop.xlane.xlu0 %95 }
  0xa1   :  { %v99_v8 = vmul.f32 0.020833334, %v96_v7  ;;  %v102_v9 = vmul.f32 %v100_v6, %v100_v6 }
  0xa3   :  { %v101_v10 = vsub.f32 %v89_v1, %v99_v8  ;;  %v104_v11 = vsel %vm90_vm0, %v102_v9, 0.0 }
  0xa4   :  { %105 = vadd.xlane.f32.xlu1 %v104_v11  ;;  %v2600_v11 = vld [vmem:[%s3305_s29 + $0x8] sm:$0xff]  }
  0xa5   :  { %v103_v12 = vmul.f32 %v101_v10, %v101_v10 }
  0xa7   :  { %v107_v13 = vsel %vm90_vm0, %v103_v12, 0.0 }
  0xa8   :  { %108 = vadd.xlane.f32.xlu1 %v107_v13  ;;  %v2601_v13 = vld [vmem:[%s3305_s29] sm:$0xff]  }
 0x12d   :  { %v106_v18 = vpop.xlane.xlu1 %105 }
 0x12e   :  { %v110_v19 = vmul.f32 0.020833334, %v106_v18  ;;  %v2930_v18 = vld [vmem:[%s3306_s1] sm:$0xff] }
 0x130   :  { %v112_v20 = vadd.f32 1e-05, %v110_v19  ;;  %v2170_v19 = vld [vmem:[%s3307_s30] ss:$0 sm:$0xff] }
 0x131   :  { %v109_v21 = vpop.xlane.xlu1 %108 }
 0x132   :  { %v111_v22 = vmul.f32 0.020833334, %v109_v21  ;;  %2634 = vrsqrt.f32 %v112_v20  ;;  %v2174_v20 = vld [vmem:[%s3308_s7] ss:$0 sm:$0xff] }
 0x134   :  { %v113_v23 = vadd.f32 1e-05, %v111_v22 }
 0x136   :  { %2636 = vrsqrt.f32 %v113_v23 }
 0x13f   :  { %v2635_v24 = vpop.eup %2634 }
 0x140   :  { %v116_v26 = vmul.f32 %v2635_v24, %v100_v6 }
 0x143   :  { %v2637_v25 = vpop.eup %2636 }
 0x144   :  { %v117_v27 = vmul.f32 %v2637_v25, %v101_v10 }
 0x146   :  { %v124_v28 = vpack.c.bf16 %v117_v27, %v116_v26 }
 0x148   :  { %2396 = vmatmul.mubr.msk.bf16.vlgmr.msra.gmra.mxu0 %vm90_vm0, %v124_v28 }
 0x149   :  { %2403 = vmatprep.mubr.msk.bf16.mxu0 %vm2685_vm1, %v2684_v14  ;;  %2400 = vmatpush3.bf16.msra.mxu0 %v2596_v48 }
 0x14a   :  { %2401 = vmatprep.subr.bf16.mxu0 %v2684_v14 }
 0x14d   :  { %2402 = vmatpush3.bf16.msra.mxu0 %v2598_v50 }
 0x14e   :  { %2415 = vmatprep.subr.bf16.mxu0 %v2684_v14 }
 0x208   :  { %v187_v30 = vpop.f32.mrf.mxu0 }
 0x209   :  { %v188_v31 = vadd.f32 %v2165_v29, %v187_v30 }
 0x20a   :  { %v2397_v32 = vpop.f32.mrf.mxu0 }
 0x20b   :  { %v196_v33 = vsel %vm195_vm2, %v188_v31, 0.0 }
 0x20c   :  { %197 = vadd.xlane.f32.xlu0 %v196_v33  ;;  %v190_v34 = vpop.f32.mrf.mxu0 }
 0x20d   :  { %v191_v35 = vadd.f32 %v2165_v29, %v190_v34 }
 0x20e   :  { %v2398_v36 = vpop.f32.mrf.mxu0 }
 0x20f   :  { %v199_v37 = vsel %vm195_vm2, %v191_v35, 0.0 }
 0x210   :  { %200 = vadd.xlane.f32.xlu1 %v199_v37 }
 0x295   :  { %v198_v38 = vpop.xlane.xlu0 %197 }
 0x296   :  { %v203_v39 = vmul.f32 0.03125, %v198_v38 }
 0x298   :  { %v205_v40 = vsub.f32 %v188_v31, %v203_v39 }
 0x299   :  { %v201_v41 = vpop.xlane.xlu1 %200 }
 0x29a   :  { %v204_v42 = vmul.f32 0.03125, %v201_v41  ;;  %v207_v43 = vmul.f32 %v205_v40, %v205_v40  ;;  %v2953_v41 = vld [vmem:[%s3265_s24] sm:$0xf] }
 0x29c   :  { %v206_v44 = vsub.f32 %v191_v35, %v204_v42  ;;  %v209_v45 = vsel %vm195_vm2, %v207_v43, 0.0 }
 0x29d   :  { %210 = vadd.xlane.f32.xlu0 %v209_v45 }
 0x29e   :  { %v208_v46 = vmul.f32 %v206_v44, %v206_v44 }
 0x2a0   :  { %v212_v47 = vsel %vm195_vm2, %v208_v46, 0.0 }
 0x2a1   :  { %213 = vadd.xlane.f32.xlu1 %v212_v47 }
 0x326   :  { %v211_v52 = vpop.xlane.xlu0 %210 }
 0x327   :  { %v215_v53 = vmul.f32 0.03125, %v211_v52 }
 0x329   :  { %v217_v54 = vadd.f32 1e-05, %v215_v53 }
 0x32a   :  { %v214_v55 = vpop.xlane.xlu1 %213 }
 0x32b   :  { %2638 = vrsqrt.f32 %v217_v54  ;;  %v216_v56 = vmul.f32 0.03125, %v214_v55 }
 0x32d   :  { %v218_v58 = vadd.f32 1e-05, %v216_v56 }
 0x32f   :  { %2640 = vrsqrt.f32 %v218_v58 }
 0x338   :  { %v2639_v0 = vpop.eup %2638 }
 0x339   :  { %v221_v1 = vmul.f32 %v2639_v0, %v205_v40 }
 0x33b   :  { %v227_v2 = vmul.f32 %v226_v62, %v221_v1 }
 0x33c   :  { %v2641_v4 = vpop.eup %2640 }
 0x33d   :  { %v222_v5 = vmul.f32 %v2641_v4, %v206_v44  ;;  %v2878_v7 = vadd.f32 %v232_v3, %v227_v2 }
 0x33f   :  { %v228_v6 = vmul.f32 %v226_v62, %v222_v5  ;;  %v235_v9 = vmax.f32 %v2878_v7, 0.0 }
 0x341   :  { %v2880_v8 = vadd.f32 %v232_v3, %v228_v6 }
 0x343   :  { %v236_v10 = vmax.f32 %v2880_v8, 0.0  ;;  %v2604_v8 = vld [vmem:[%s3269_s13 + $0x8] sm:$0xff]  }
 0x345   :  { %v241_v12 = vpack.c.bf16 %v236_v10, %v235_v9 }
 0x347   :  { %2404 = vmatmul.mubr.msk.bf16.vlgmr.msra.gmra.mxu0 %vm195_vm2, %v241_v12  ;;  %2412 = vmatmul.mubr.msk.bf16.vlgmr.msra.gmra.mxu1 %vm195_vm2, %v241_v12 }
 0x348   :  { %2416 = vmatpush3.bf16.msra.mxu0 %v2600_v11  ;;  %2419 = vmatprep.mubr.msk.bf16.mxu0 %vm2685_vm1, %v2684_v14 }
 0x349   :  { %2417 = vmatprep.subr.bf16.mxu0 %v2684_v14  ;;  %2424 = vmatpush3.msra.mxu1 %v2903_v15 }
 0x34a   :  { %2425 = vmatprep.subr.mxu1 %v2912_v16 }
 0x34b   :  { %2426 = vmatpush3.msra.mxu1 %v2912_v16 }
 0x34c   :  { %2418 = vmatpush3.bf16.msra.mxu0 %v2601_v13  ;;  %2427 = vmatprep.subr.mxu1 %v2921_v17 }
 0x34d   :  { %2434 = vmatprep.subr.mxu0 %v2903_v15  ;;  %2428 = vmatpush3.msra.mxu1 %v2921_v17 }
 0x34e   :  { %2429 = vmatprep.subr.mxu1 %v2930_v18 }
 0x34f   :  { %2420 = vmatmul.mubr.msk.bf16.vlgmr.msra.gmra.mxu0 %vm195_vm2, %v241_v12  ;;  %2430 = vmatpush3.msra.mxu1 %v2930_v18 }
 0x350   :  { %2435 = vmatpush3.msra.mxu0 %v2903_v15  ;;  %2445 = vmatprep.subr.msk.mxu1 %vm630_vm3, %v2953_v41 }
 0x351   :  { %2436 = vmatprep.subr.mxu0 %v2912_v16 }
 0x352   :  { %2437 = vmatpush3.msra.mxu0 %v2912_v16 }
 0x353   :  { %2438 = vmatprep.subr.mxu0 %v2921_v17 }
 0x354   :  { %2439 = vmatpush3.msra.mxu0 %v2921_v17 }
 0x355   :  { %2440 = vmatprep.subr.mxu0 %v2930_v18 }
 0x356   :  { %2441 = vmatpush3.msra.mxu0 %v2930_v18 }
 0x357   :  { %2450 = vmatprep.subr.msk.mxu0 %vm630_vm3, %v2953_v41 }
 0x407   :  { %v298_v21 = vpop.f32.mrf.mxu0  ;;  %v362_v22 = vpop.f32.mrf.mxu1 }
 0x408   :  { %v299_v23 = vadd.f32 %v2170_v19, %v298_v21  ;;  %v363_v24 = vadd.f32 %v2174_v20, %v362_v22  ;;  %v2178_v21 = vld [vmem:[%s3267_s9] ss:$0 sm:$0xff] }
 0x409   :  { %v2405_v25 = vpop.f32.mrf.mxu0  ;;  %v2413_v26 = vpop.f32.mrf.mxu1 }
 0x40a   :  { %v433_v27 = vmul.f32 %v363_v24, %v299_v23 }
 0x40b   :  { %v301_v28 = vpop.f32.mrf.mxu0  ;;  %v365_v29 = vpop.f32.mrf.mxu1 }
 0x40c   :  { %v302_v30 = vadd.f32 %v2170_v19, %v301_v28  ;;  %v366_v31 = vadd.f32 %v2174_v20, %v365_v29  ;;  %2431 = vmatprep.mubr.msk.f32.mxu1 %vm195_vm2, %v433_v27  ;;  %v2602_v19 = vld [vmem:[%s3266_s10 + $0x8] sm:$0xff]   ;;  %v2603_v20 = vld [vmem:[%s3266_s10] sm:$0xff]  }
 0x40d   :  { %v2406_v32 = vpop.f32.mrf.mxu0  ;;  %v2414_v33 = vpop.f32.mrf.mxu1 }
 0x40e   :  { %v519_v34 = vmul.f32 %v363_v24, %v302_v30  ;;  %v434_v35 = vmul.f32 %v366_v31, %v302_v30  ;;  %v518_v36 = vmul.f32 %v366_v31, %v299_v23 }
 0x40f   :  { %v2943_v37 = vpop.f32.mrf.mxu0 }
 0x410   :  { %2432 = vmatmul.mubr.msk.f32.vlgmr.msra.gmra.mxu1 %vm195_vm2, %v434_v35  ;;  %2442 = vmatprep.mubr.msk.f32.mxu0 %vm195_vm2, %v518_v36  ;;  %v427_v22 = vadd.f32 %v2178_v21, %v2943_v37  ;;  %v2192_v35 = vld [vmem:[%s3268_s11] ss:$0 sm:$0xff] }
 0x411   :  { %v2421_v38 = vpop.f32.mrf.mxu0  ;;  %2443 = vmatmul.mubr.msk.f32.vlgmr.msra.gmra.mxu0 %vm195_vm2, %v519_v34  ;;  %2446 = vmatpush3.msk.msra.mxu1 %vm630_vm3, %v2953_v41 }
 0x412   :  { %2451 = vmatpush3.msk.msra.mxu0 %vm630_vm3, %v2953_v41  ;;  %2455 = vmatprep.subr.bf16.mxu1 %v2684_v14 }
 0x413   :  { %v2948_v39 = vpop.f32.mrf.mxu0  ;;  %2463 = vmatprep.subr.bf16.mxu0 %v2684_v14 }
 0x414   :  { %v430_v23 = vadd.f32 %v2178_v21, %v2948_v39 }
 0x415   :  { %v2422_v40 = vpop.f32.mrf.mxu0 }
 0x4d0   :  { %v2433_v42 = vpop.f32.mrf.mxu1 }
 0x4d1   :  { %v517_v43 = vmul.f32 0.35355338, %v2433_v42  ;;  %v2444_v44 = vpop.f32.mrf.mxu0 }
 0x4d2   :  { %v602_v45 = vmul.f32 0.35355338, %v2444_v44  ;;  %v507_v46 = vpop.f32.mrf.mxu1 }
 0x4d3   :  { %v516_v47 = vmul.f32 0.35355338, %v507_v46  ;;  %v592_v48 = vpop.f32.mrf.mxu0 }
 0x4d4   :  { %v604_v49 = vmax.f32 %v517_v43, %v602_v45  ;;  %v601_v50 = vmul.f32 0.35355338, %v592_v48 }
 0x4d6   :  { %v606_v51 = vsub.f32 %v517_v43, %v604_v49  ;;  %v612_v52 = vsub.f32 %v602_v45, %v604_v49  ;;  %v603_v53 = vmax.f32 %v516_v47, %v601_v50 }
 0x4d8   :  { %v609_v54 = vmul.f32 1.442695, %v606_v51  ;;  %v615_v55 = vmul.f32 1.442695, %v612_v52  ;;  %v605_v56 = vsub.f32 %v516_v47, %v603_v53  ;;  %v611_v57 = vsub.f32 %v601_v50, %v603_v53 }
 0x4da   :  { %2642 = vpow2.f32 %v609_v54  ;;  %v607_v58 = vmul.f32 1.442695, %v605_v56  ;;  %v613_v59 = vmul.f32 1.442695, %v611_v57  ;;  %v2607_v56 = vld [vmem:[%s3270_s15 + $0x30] sm:$0xff]   ;;  %v2608_v57 = vld [vmem:[%s3270_s15 + $0x28] sm:$0xff]  }
 0x4db   :  { %2644 = vpow2.f32 %v615_v55  ;;  %v2606_v55 = vld [vmem:[%s3270_s15 + $0x38] sm:$0xff]  }
 0x4dc   :  { %2646 = vpow2.f32 %v607_v58  ;;  %v2609_v58 = vld [vmem:[%s3270_s15 + $0x20] sm:$0xff]  }
 0x4dd   :  { %2648 = vpow2.f32 %v613_v59  ;;  %v2610_v59 = vld [vmem:[%s3270_s15 + $0x18] sm:$0xff]  }
 0x4e7   :  { %v2643_v61 = vpop.eup %2642 }
 0x4e8   :  { %v2645_v62 = vpop.eup %2644 }
 0x4e9   :  { %v2647_v0 = vpop.eup %2646  ;;  %v618_v1 = vadd.f32 %v2645_v62, %v2643_v61 }
 0x4ea   :  { %v2649_v2 = vpop.eup %2648 }
 0x4eb   :  { %v617_v3 = vadd.f32 %v2649_v2, %v2647_v0  ;;  %2650 = vrcp.f32 %v618_v1 }
 0x4ed   :  { %2652 = vrcp.f32 %v617_v3 }
 0x4f8   :  { %v2651_v4 = vpop.eup %2650 }
 0x4f9   :  { %v622_v12 = vmul.f32 %v2651_v4, %v2643_v61  ;;  %v714_v13 = vmul.f32 %v2651_v4, %v2645_v62  ;;  %v870_v4 = vld [vmem:[%s3271_s12] sm:$0x3] }
 0x4fa   :  { %v2653_v5 = vpop.eup %2652 }
 0x4fb   :  { %v621_v6 = vmul.f32 %v2653_v5, %v2647_v0  ;;  %v713_v11 = vmul.f32 %v2653_v5, %v2649_v2 }
 0x4fd   :  { %2447 = vmatprep.mubr.msk.f32.mxu1 %vm623_vm4, %v621_v6  ;;  %2452 = vmatprep.mubr.msk.f32.mxu0 %vm623_vm4, %v713_v11  ;;  %v900_v11 = vrot.slane %v870_v4, %v2869_v60 }
 0x4fe   :  { %2448 = vmatmul.mubr.msk.f32.vlgmr.msra.gmra.mxu1 %vm623_vm4, %v622_v12  ;;  %2453 = vmatmul.mubr.msk.f32.vlgmr.msra.gmra.mxu0 %vm623_vm4, %v714_v13 }
 0x4ff   :  { %2459 = vmatprep.mubr.msk.bf16.mxu1 %vm2685_vm1, %v2684_v14  ;;  %2467 = vmatprep.mubr.msk.bf16.mxu0 %vm2685_vm1, %v2684_v14 }
 0x500   :  { %2456 = vmatpush3.bf16.msra.mxu1 %v2602_v19  ;;  %2464 = vmatpush3.bf16.msra.mxu0 %v2604_v8 }
 0x501   :  { %2457 = vmatprep.subr.bf16.mxu1 %v2684_v14  ;;  %2465 = vmatprep.subr.bf16.mxu0 %v2684_v14 }
 0x504   :  { %2458 = vmatpush3.bf16.msra.mxu1 %v2603_v20  ;;  %v906_v20 = vrot.slane %v870_v4, %v2875_v63 }
 0x505   :  { %2471 = vmatprep.subr.bf16.mxu1 %v2684_v14 }
 0x5be   :  { %v2449_v24 = vpop.f32.mrf.mxu1  ;;  %v2454_v25 = vpop.f32.mrf.mxu0 }
 0x5bf   :  { %v710_v26 = vmul.f32 %v2449_v24, %v430_v23  ;;  %v797_v27 = vmul.f32 %v2454_v25, %v427_v22  ;;  %v2611_v25 = vld [vmem:[%s3270_s15 + $0x10] sm:$0xff]  }
 0x5c0   :  { %v700_v28 = vpop.f32.mrf.mxu1  ;;  %v787_v29 = vpop.f32.mrf.mxu0 }
 0x5c1   :  { %v799_v30 = vadd.f32 %v797_v27, %v710_v26  ;;  %v709_v31 = vmul.f32 %v700_v28, %v427_v22  ;;  %v796_v32 = vmul.f32 %v787_v29, %v430_v23  ;;  %v2612_v26 = vld [vmem:[%s3270_s15 + $0x8] sm:$0xff]   ;;  %v2613_v27 = vld [vmem:[%s3270_s15] sm:$0xff]  }
 0x5c2   :  { %v2196_v28 = vld [vmem:[%s3272_s14] ss:$0 sm:$0xff] }
 0x5c3   :  { %v798_v33 = vadd.f32 %v796_v32, %v709_v31 }
 0x5c5   :  { %v804_v34 = vpack.c.bf16 %v799_v30, %v798_v33 }
 0x5c7   :  { %2460 = vmatmul.mubr.msk.bf16.vlgmr.msra.gmra.mxu1 %vm195_vm2, %v804_v34 }
 0x5c8   :  { %2487 = vmatprep.mubr.msk.bf16.mxu1 %vm2685_vm1, %v2684_v14  ;;  %2472 = vmatpush3.bf16.msra.mxu1 %v2606_v55 }
 0x5c9   :  { %2473 = vmatprep.subr.bf16.mxu1 %v2684_v14 }
 0x5cc   :  { %2474 = vmatpush3.bf16.msra.mxu1 %v2607_v56  ;;  %v2614_v56 = vld [vmem:[%s3302_s3 + $0x18] sm:$0xff]  }
 0x5cd   :  { %2475 = vmatprep.subr.bf16.mxu1 %v2684_v14 }
 0x5d0   :  { %2476 = vmatpush3.bf16.msra.mxu1 %v2608_v57  ;;  %v2615_v57 = vld [vmem:[%s3302_s3 + $0x10] sm:$0xff]  }
 0x5d1   :  { %2477 = vmatprep.subr.bf16.mxu1 %v2684_v14 }
 0x5d4   :  { %2478 = vmatpush3.bf16.msra.mxu1 %v2609_v58 }
 0x5d5   :  { %2479 = vmatprep.subr.bf16.mxu1 %v2684_v14 }
 0x5d8   :  { %2480 = vmatpush3.bf16.msra.mxu1 %v2610_v59 }
 0x5d9   :  { %2481 = vmatprep.subr.bf16.mxu1 %v2684_v14 }
 0x5dc   :  { %2482 = vmatpush3.bf16.msra.mxu1 %v2611_v25  ;;  %v2618_v25 = vld [vmem:[%s3305_s29 + $0x18] sm:$0xff]  }
 0x5dd   :  { %2483 = vmatprep.subr.bf16.mxu1 %v2684_v14 }
 0x5e0   :  { %2484 = vmatpush3.bf16.msra.mxu1 %v2612_v26  ;;  %v2619_v26 = vld [vmem:[%s3305_s29 + $0x10] sm:$0xff]  }
 0x5e1   :  { %2485 = vmatprep.subr.bf16.mxu1 %v2684_v14 }
 0x5e4   :  { %2486 = vmatpush3.bf16.msra.mxu1 %v2613_v27 }
 0x5e5   :  { %2526 = vmatprep.subr.mxu1 %v2903_v15 }
 0x687   :  { %v861_v36 = vpop.f32.mrf.mxu1 }
 0x688   :  { %v862_v37 = vadd.f32 %v2192_v35, %v861_v36 }
 0x689   :  { %v2461_v38 = vpop.f32.mrf.mxu1 }
 0x68a   :  { %v868_v39 = vadd.f32 %v862_v37, %v235_v9  ;;  %v2200_v38 = vld [vmem:[%s3273_s16] ss:$0 sm:$0xff] }
 0x68b   :  { %v864_v40 = vpop.f32.mrf.mxu1 }
 0x68c   :  { %v865_v42 = vadd.f32 %v2192_v35, %v864_v40  ;;  %v871_v43 = vsel %vm195_vm2, %v868_v39, 0.0 }
 0x68d   :  { %872 = vadd.xlane.f32.xlu0 %v871_v43  ;;  %v2462_v44 = vpop.f32.mrf.mxu1 }
 0x68e   :  { %v869_v45 = vadd.f32 %v865_v42, %v236_v10  ;;  %v2605_v10 = vld [vmem:[%s3269_s13] sm:$0xff]  }
 0x68f   :  { %2466 = vmatpush3.bf16.msra.mxu0 %v2605_v10 }
 0x690   :  { %v874_v46 = vsel %vm195_vm2, %v869_v45, 0.0  ;;  %2491 = vmatprep.subr.bf16.mxu0 %v2684_v14 }
 0x691   :  { %875 = vadd.xlane.f32.xlu1 %v874_v46 }
 0x716   :  { %v873_v47 = vpop.xlane.xlu0 %872 }
 0x717   :  { %v877_v48 = vmul.f32 0.03125, %v873_v47 }
 0x719   :  { %v879_v49 = vsub.f32 %v868_v39, %v877_v48 }
 0x71a   :  { %v876_v50 = vpop.xlane.xlu1 %875 }
 0x71b   :  { %v878_v51 = vmul.f32 0.03125, %v876_v50  ;;  %v881_v52 = vmul.f32 %v879_v49, %v879_v49 }
 0x71d   :  { %v880_v7 = vsub.f32 %v869_v45, %v878_v51  ;;  %v883_v9 = vsel %vm195_vm2, %v881_v52, 0.0 }
 0x71e   :  { %884 = vadd.xlane.f32.xlu0 %v883_v9 }
 0x71f   :  { %v882_v53 = vmul.f32 %v880_v7, %v880_v7 }
 0x721   :  { %v886_v54 = vsel %vm195_vm2, %v882_v53, 0.0 }
 0x722   :  { %887 = vadd.xlane.f32.xlu1 %v886_v54 }
 0x7a7   :  { %v885_v61 = vpop.xlane.xlu0 %884 }
 0x7a8   :  { %v889_v62 = vmul.f32 0.03125, %v885_v61 }
 0x7aa   :  { %v891_v0 = vadd.f32 1e-05, %v889_v62 }
 0x7ab   :  { %v888_v1 = vpop.xlane.xlu1 %887 }
 0x7ac   :  { %2654 = vrsqrt.f32 %v891_v0  ;;  %v890_v2 = vmul.f32 0.03125, %v888_v1 }
 0x7ae   :  { %v892_v3 = vadd.f32 1e-05, %v890_v2  ;;  %v1094_v2 = vld [vmem:[%s3274_s17] sm:$0x3] }
 0x7b0   :  { %2656 = vrsqrt.f32 %v892_v3 }
 0x7b9   :  { %v2655_v5 = vpop.eup %2654 }
 0x7ba   :  { %v895_v6 = vmul.f32 %v2655_v5, %v879_v49  ;;  %v1124_v5 = vrot.slane %v1094_v2, %v2869_v60 }
 0x7bc   :  { %v901_v19 = vmul.f32 %v900_v11, %v895_v6 }
 0x7bd   :  { %v2657_v12 = vpop.eup %2656 }
 0x7be   :  { %v896_v13 = vmul.f32 %v2657_v12, %v880_v7  ;;  %v907_v22 = vadd.f32 %v906_v20, %v901_v19 }
 0x7c0   :  { %v902_v21 = vmul.f32 %v900_v11, %v896_v13  ;;  %v1130_v13 = vrot.slane %v1094_v2, %v2875_v63 }
 0x7c2   :  { %v908_v23 = vadd.f32 %v906_v20, %v902_v21 }
 0x7c4   :  { %v913_v24 = vpack.c.bf16 %v908_v23, %v907_v22 }
 0x7c6   :  { %2468 = vmatmul.mubr.msk.bf16.vlgmr.msra.gmra.mxu0 %vm195_vm2, %v913_v24  ;;  %v2617_v24 = vld [vmem:[%s3303_s4 + $0x10] sm:$0xff]  }
 0x7c7   :  { %2495 = vmatprep.mubr.msk.bf16.mxu0 %vm2685_vm1, %v2684_v14  ;;  %2492 = vmatpush3.bf16.msra.mxu0 %v2614_v56 }
 0x7c8   :  { %2493 = vmatprep.subr.bf16.mxu0 %v2684_v14 }
 0x7cb   :  { %2494 = vmatpush3.bf16.msra.mxu0 %v2615_v57 }
 0x7cc   :  { %2499 = vmatprep.subr.bf16.mxu0 %v2684_v14 }
 0x886   :  { %v970_v29 = vpop.f32.mrf.mxu0 }
 0x887   :  { %v971_v31 = vadd.f32 %v2196_v28, %v970_v29 }
 0x888   :  { %v2469_v30 = vpop.f32.mrf.mxu0 }
 0x889   :  { %v977_v35 = vmax.f32 %v971_v31, 0.0 }
 0x88a   :  { %v973_v32 = vpop.f32.mrf.mxu0 }
 0x88b   :  { %v974_v33 = vadd.f32 %v2196_v28, %v973_v32 }
 0x88c   :  { %v2470_v34 = vpop.f32.mrf.mxu0 }
 0x88d   :  { %v978_v36 = vmax.f32 %v974_v33, 0.0 }
 0x88f   :  { %v995_v37 = vpack.c.bf16 %v978_v36, %v977_v35 }
 0x891   :  { %2488 = vmatmul.mubr.bf16.vlgmr.msra.gmra.mxu1 %v995_v37 }
 0x892   :  { %2527 = vmatpush3.msra.mxu1 %v2903_v15 }
 0x893   :  { %2528 = vmatprep.subr.mxu1 %v2912_v16 }
 0x894   :  { %2529 = vmatpush3.msra.mxu1 %v2912_v16 }
 0x895   :  { %2530 = vmatprep.subr.mxu1 %v2921_v17 }
 0x896   :  { %2531 = vmatpush3.msra.mxu1 %v2921_v17 }
 0x897   :  { %2532 = vmatprep.subr.mxu1 %v2930_v18 }
 0x898   :  { %2533 = vmatpush3.msra.mxu1 %v2930_v18 }
 0x899   :  { %2547 = vmatprep.subr.bf16.mxu1 %v2684_v14 }
 0x951   :  { %v1085_v39 = vpop.f32.mrf.mxu1 }
 0x952   :  { %v1086_v40 = vadd.f32 %v2200_v38, %v1085_v39 }
 0x953   :  { %v2489_v42 = vpop.f32.mrf.mxu1 }
 0x954   :  { %v1092_v43 = vadd.f32 %v1086_v40, %v907_v22  ;;  %v2616_v22 = vld [vmem:[%s3303_s4 + $0x18] sm:$0xff]  }
 0x955   :  { %v1088_v44 = vpop.f32.mrf.mxu1 }
 0x956   :  { %v1089_v45 = vadd.f32 %v2200_v38, %v1088_v44  ;;  %v1095_v46 = vsel %vm195_vm2, %v1092_v43, 0.0 }
 0x957   :  { %1096 = vadd.xlane.f32.xlu0 %v1095_v46  ;;  %v2490_v47 = vpop.f32.mrf.mxu1 }
 0x958   :  { %v1093_v48 = vadd.f32 %v1089_v45, %v908_v23 }
 0x95a   :  { %v1098_v49 = vsel %vm195_vm2, %v1093_v48, 0.0 }
 0x95b   :  { %1099 = vadd.xlane.f32.xlu1 %v1098_v49 }
 0x9e0   :  { %v1097_v50 = vpop.xlane.xlu0 %1096 }
 0x9e1   :  { %v1101_v51 = vmul.f32 0.03125, %v1097_v50 }
 0x9e3   :  { %v1103_v52 = vsub.f32 %v1092_v43, %v1101_v51 }
 0x9e4   :  { %v1100_v7 = vpop.xlane.xlu1 %1099 }
 0x9e5   :  { %v1102_v9 = vmul.f32 0.03125, %v1100_v7  ;;  %v1105_v53 = vmul.f32 %v1103_v52, %v1103_v52 }
 0x9e7   :  { %v1104_v54 = vsub.f32 %v1093_v48, %v1102_v9  ;;  %v1107_v8 = vsel %vm195_vm2, %v1105_v53, 0.0 }
 0x9e8   :  { %1108 = vadd.xlane.f32.xlu0 %v1107_v8 }
 0x9e9   :  { %v1106_v10 = vmul.f32 %v1104_v54, %v1104_v54 }
 0x9eb   :  { %v1110_v55 = vsel %vm195_vm2, %v1106_v10, 0.0 }
 0x9ec   :  { %1111 = vadd.xlane.f32.xlu1 %v1110_v55 }
 0xa71   :  { %v1109_v58 = vpop.xlane.xlu0 %1108 }
 0xa72   :  { %v1113_v59 = vmul.f32 0.03125, %v1109_v58 }
 0xa74   :  { %v1115_v61 = vadd.f32 1e-05, %v1113_v59 }
 0xa75   :  { %v1112_v62 = vpop.xlane.xlu1 %1111 }
 0xa76   :  { %2658 = vrsqrt.f32 %v1115_v61  ;;  %v1114_v0 = vmul.f32 0.03125, %v1112_v62 }
 0xa78   :  { %v1116_v1 = vadd.f32 1e-05, %v1114_v0 }
 0xa7a   :  { %2660 = vrsqrt.f32 %v1116_v1 }
 0xa83   :  { %v2659_v3 = vpop.eup %2658 }
 0xa84   :  { %v1119_v4 = vmul.f32 %v2659_v3, %v1103_v52 }
 0xa86   :  { %v1125_v12 = vmul.f32 %v1124_v5, %v1119_v4 }
 0xa87   :  { %v2661_v6 = vpop.eup %2660 }
 0xa88   :  { %v1120_v11 = vmul.f32 %v2661_v6, %v1104_v54  ;;  %v3079_v20 = vadd.f32 %v1130_v13, %v1125_v12 }
 0xa8a   :  { %v1126_v19 = vmul.f32 %v1124_v5, %v1120_v11 }
 0xa8c   :  { %v3081_v21 = vadd.f32 %v1130_v13, %v1126_v19  ;;  %v2620_v19 = vld [vmem:[%s3266_s10 + $0x18] sm:$0xff]  }
 0xa8e   :  { %v1138_v23 = vpack.c.bf16 %v3081_v21, %v3079_v20 }
 0xa90   :  { %2496 = vmatmul.mubr.msk.bf16.vlgmr.msra.gmra.mxu0 %vm195_vm2, %v1138_v23 }
 0xa91   :  { %2500 = vmatpush3.bf16.msra.mxu0 %v2616_v22  ;;  %2503 = vmatprep.mubr.msk.bf16.mxu0 %vm2685_vm1, %v2684_v14  ;;  %v2232_v22 = vld [vmem:[%s3267_s9 + $0x1] ss:$0 sm:$0xff] }
 0xa92   :  { %2501 = vmatprep.subr.bf16.mxu0 %v2684_v14 }
 0xa95   :  { %2502 = vmatpush3.bf16.msra.mxu0 %v2617_v24 }
 0xa96   :  { %2507 = vmatprep.subr.bf16.mxu0 %v2684_v14 }
 0xa98   :  { %2504 = vmatmul.mubr.msk.bf16.vlgmr.msra.gmra.mxu0 %vm195_vm2, %v1138_v23 }
 0xa99   :  { %2508 = vmatpush3.bf16.msra.mxu0 %v2618_v25  ;;  %2511 = vmatprep.mubr.msk.bf16.mxu0 %vm2685_vm1, %v2684_v14 }
 0xa9a   :  { %2509 = vmatprep.subr.bf16.mxu0 %v2684_v14 }
 0xa9d   :  { %2510 = vmatpush3.bf16.msra.mxu0 %v2619_v26 }
 0xa9e   :  { %2515 = vmatprep.subr.mxu0 %v2903_v15 }
 0xaa0   :  { %2512 = vmatmul.mubr.msk.bf16.vlgmr.msra.gmra.mxu0 %vm195_vm2, %v1138_v23 }
 0xaa1   :  { %2516 = vmatpush3.msra.mxu0 %v2903_v15  ;;  %v2214_v15 = vld [vmem:[%s3307_s30 + $0x1] ss:$0 sm:$0xff] }
 0xaa2   :  { %2517 = vmatprep.subr.mxu0 %v2912_v16 }
 0xaa3   :  { %2518 = vmatpush3.msra.mxu0 %v2912_v16  ;;  %v2223_v16 = vld [vmem:[%s3308_s7 + $0x1] ss:$0 sm:$0xff] }
 0xaa4   :  { %2519 = vmatprep.subr.mxu0 %v2921_v17 }
 0xaa5   :  { %2520 = vmatpush3.msra.mxu0 %v2921_v17 }
 0xaa6   :  { %2521 = vmatprep.subr.mxu0 %v2930_v18 }
 0xaa7   :  { %2522 = vmatpush3.msra.mxu0 %v2930_v18 }
 0xaa8   :  { %2537 = vmatprep.subr.msk.mxu0 %vm630_vm3, %v2953_v41 }
 0xb50   :  { %v1196_v27 = vpop.f32.mrf.mxu0 }
 0xb51   :  { %v1197_v31 = vadd.f32 %v2214_v15, %v1196_v27 }
 0xb52   :  { %v2497_v28 = vpop.f32.mrf.mxu0 }
 0xb54   :  { %v1199_v29 = vpop.f32.mrf.mxu0 }
 0xb55   :  { %v1200_v35 = vadd.f32 %v2214_v15, %v1199_v29 }
 0xb56   :  { %v2498_v30 = vpop.f32.mrf.mxu0 }
 0xb58   :  { %v1262_v17 = vpop.f32.mrf.mxu0 }
 0xb59   :  { %v1263_v32 = vadd.f32 %v2223_v16, %v1262_v17 }
 0xb5a   :  { %v2505_v33 = vpop.f32.mrf.mxu0 }
 0xb5b   :  { %v1335_v18 = vmul.f32 %v1263_v32, %v1197_v31  ;;  %v1421_v40 = vmul.f32 %v1263_v32, %v1200_v35  ;;  %v2251_v33 = vld [vmem:[%s3268_s11 + $0x1] ss:$0 sm:$0xff] }
 0xb5c   :  { %v1265_v34 = vpop.f32.mrf.mxu0 }
 0xb5d   :  { %v1266_v36 = vadd.f32 %v2223_v16, %v1265_v34  ;;  %2523 = vmatprep.mubr.msk.f32.mxu0 %vm195_vm2, %v1335_v18 }
 0xb5e   :  { %v2506_v37 = vpop.f32.mrf.mxu0 }
 0xb5f   :  { %v1336_v38 = vmul.f32 %v1266_v36, %v1200_v35  ;;  %v1420_v39 = vmul.f32 %v1266_v36, %v1197_v31 }
 0xb60   :  { %v1328_v42 = vpop.f32.mrf.mxu0 }
 0xb61   :  { %2524 = vmatmul.mubr.msk.f32.vlgmr.msra.gmra.mxu0 %vm195_vm2, %v1336_v38  ;;  %2534 = vmatprep.mubr.msk.f32.mxu1 %vm195_vm2, %v1420_v39  ;;  %v1329_v25 = vadd.f32 %v2232_v22, %v1328_v42 }
 0xb62   :  { %v2513_v43 = vpop.f32.mrf.mxu0  ;;  %2535 = vmatmul.mubr.msk.f32.vlgmr.msra.gmra.mxu1 %vm195_vm2, %v1421_v40  ;;  %2538 = vmatpush3.msk.msra.mxu0 %vm630_vm3, %v2953_v41 }
 0xb63   :  { %2542 = vmatprep.subr.msk.mxu0 %vm630_vm3, %v2953_v41  ;;  %2551 = vmatprep.mubr.msk.bf16.mxu1 %vm2685_vm1, %v2684_v14 }
 0xb64   :  { %v1331_v44 = vpop.f32.mrf.mxu0  ;;  %2548 = vmatpush3.bf16.msra.mxu1 %v2620_v19 }
 0xb65   :  { %2549 = vmatprep.subr.bf16.mxu1 %v2684_v14  ;;  %v1332_v26 = vadd.f32 %v2232_v22, %v1331_v44  ;;  %v2630_v22 = vld [vmem:[%s3270_s15 + $0x48] sm:$0xff]  }
 0xb66   :  { %v2514_v45 = vpop.f32.mrf.mxu0 }
 0xc21   :  { %v2525_v46 = vpop.f32.mrf.mxu0 }
 0xc22   :  { %v1419_v47 = vmul.f32 0.35355338, %v2525_v46  ;;  %v2536_v48 = vpop.f32.mrf.mxu1 }
 0xc23   :  { %v1504_v49 = vmul.f32 0.35355338, %v2536_v48  ;;  %v1409_v50 = vpop.f32.mrf.mxu0 }
 0xc24   :  { %v1418_v51 = vmul.f32 0.35355338, %v1409_v50  ;;  %v1494_v52 = vpop.f32.mrf.mxu1 }
 0xc25   :  { %v1506_v7 = vmax.f32 %v1419_v47, %v1504_v49  ;;  %v1503_v9 = vmul.f32 0.35355338, %v1494_v52 }
 0xc27   :  { %v1508_v53 = vsub.f32 %v1419_v47, %v1506_v7  ;;  %v1514_v54 = vsub.f32 %v1504_v49, %v1506_v7  ;;  %v1505_v8 = vmax.f32 %v1418_v51, %v1503_v9  ;;  %v2623_v7 = vld [vmem:[%s3269_s13 + $0x10] sm:$0xff]  }
 0xc29   :  { %v1511_v10 = vmul.f32 1.442695, %v1508_v53  ;;  %v1517_v55 = vmul.f32 1.442695, %v1514_v54  ;;  %v1507_v56 = vsub.f32 %v1418_v51, %v1505_v8  ;;  %v1513_v57 = vsub.f32 %v1503_v9, %v1505_v8  ;;  %v2624_v9 = vld [vmem:[%s3270_s15 + $0x78] sm:$0xff]   ;;  %v2625_v53 = vld [vmem:[%s3270_s15 + $0x70] sm:$0xff]  }
 0xc2a   :  { %v2626_v54 = vld [vmem:[%s3270_s15 + $0x68] sm:$0xff]   ;;  %v2627_v8 = vld [vmem:[%s3270_s15 + $0x60] sm:$0xff]  }
 0xc2b   :  { %2662 = vpow2.f32 %v1511_v10  ;;  %v1509_v58 = vmul.f32 1.442695, %v1507_v56  ;;  %v1515_v59 = vmul.f32 1.442695, %v1513_v57  ;;  %v2628_v10 = vld [vmem:[%s3270_s15 + $0x58] sm:$0xff]  }
 0xc2c   :  { %2664 = vpow2.f32 %v1517_v55 }
 0xc2d   :  { %2666 = vpow2.f32 %v1509_v58 }
 0xc2e   :  { %2668 = vpow2.f32 %v1515_v59 }
 0xc38   :  { %v2663_v61 = vpop.eup %2662 }
 0xc39   :  { %v2665_v62 = vpop.eup %2664 }
 0xc3a   :  { %v2667_v0 = vpop.eup %2666  ;;  %v1520_v1 = vadd.f32 %v2665_v62, %v2663_v61 }
 0xc3b   :  { %v2669_v2 = vpop.eup %2668 }
 0xc3c   :  { %v1519_v3 = vadd.f32 %v2669_v2, %v2667_v0  ;;  %2670 = vrcp.f32 %v1520_v1 }
 0xc3e   :  { %2672 = vrcp.f32 %v1519_v3 }
 0xc49   :  { %v2671_v4 = vpop.eup %2670 }
 0xc4a   :  { %v1524_v11 = vmul.f32 %v2671_v4, %v2663_v61  ;;  %v1611_v13 = vmul.f32 %v2671_v4, %v2665_v62  ;;  %v2255_v62 = vld [vmem:[%s3271_s12 + $0x2] sm:$0x3] }
 0xc4b   :  { %v2673_v5 = vpop.eup %2672 }
 0xc4c   :  { %v1523_v6 = vmul.f32 %v2673_v5, %v2667_v0  ;;  %v1610_v12 = vmul.f32 %v2673_v5, %v2669_v2  ;;  %v1800_v2 = vrot.slane %v2255_v62, %v2869_v60 }
 0xc4e   :  { %2539 = vmatprep.mubr.msk.f32.mxu0 %vm623_vm4, %v1523_v6  ;;  %v1806_v6 = vrot.slane %v2255_v62, %v2875_v63 }
 0xc4f   :  { %2540 = vmatmul.mubr.msk.f32.vlgmr.msra.gmra.mxu0 %vm623_vm4, %v1524_v11 }
 0xc50   :  { %2543 = vmatpush3.msk.msra.mxu0 %vm630_vm3, %v2953_v41  ;;  %2544 = vmatprep.mubr.msk.f32.mxu0 %vm623_vm4, %v1610_v12  ;;  %v2621_v41 = vld [vmem:[%s3266_s10 + $0x10] sm:$0xff]  }
 0xc51   :  { %2555 = vmatprep.subr.bf16.mxu0 %v2684_v14  ;;  %2550 = vmatpush3.bf16.msra.mxu1 %v2621_v41  ;;  %v2629_v41 = vld [vmem:[%s3270_s15 + $0x50] sm:$0xff]  }
 0xc52   :  { %2563 = vmatprep.subr.bf16.mxu1 %v2684_v14 }
 0xc53   :  { %2545 = vmatmul.mubr.msk.f32.vlgmr.msra.gmra.mxu0 %vm623_vm4, %v1611_v13 }
 0xc54   :  { %2559 = vmatprep.mubr.msk.bf16.mxu0 %vm2685_vm1, %v2684_v14 }
 0xd0f   :  { %v2541_v23 = vpop.f32.mrf.mxu0 }
 0xd10   :  { %v1607_v28 = vmul.f32 %v2541_v23, %v1332_v26  ;;  %v2631_v23 = vld [vmem:[%s3270_s15 + $0x40] sm:$0xff]  }
 0xd11   :  { %v1597_v24 = vpop.f32.mrf.mxu0 }
 0xd12   :  { %v1606_v30 = vmul.f32 %v1597_v24, %v1329_v25  ;;  %v2261_v24 = vld [vmem:[%s3272_s14 + $0x1] ss:$0 sm:$0xff] }
 0xd13   :  { %v2546_v27 = vpop.f32.mrf.mxu0 }
 0xd14   :  { %v1694_v29 = vmul.f32 %v2546_v27, %v1329_v25 }
 0xd15   :  { %v1684_v15 = vpop.f32.mrf.mxu0 }
 0xd16   :  { %v1696_v16 = vadd.f32 %v1694_v29, %v1607_v28  ;;  %v1693_v17 = vmul.f32 %v1684_v15, %v1332_v26 }
 0xd18   :  { %v1695_v31 = vadd.f32 %v1693_v17, %v1606_v30 }
 0xd1a   :  { %v1702_v32 = vpack.c.bf16 %v1696_v16, %v1695_v31  ;;  %v2282_v31 = vld [vmem:[%s3273_s16 + $0x1] ss:$0 sm:$0xff] }
 0xd1c   :  { %2552 = vmatmul.mubr.msk.bf16.vlgmr.msra.gmra.mxu1 %vm195_vm2, %v1702_v32 }
 0xd1d   :  { %2579 = vmatprep.mubr.msk.bf16.mxu1 %vm2685_vm1, %v2684_v14  ;;  %2564 = vmatpush3.bf16.msra.mxu1 %v2624_v9 }
 0xd1e   :  { %2565 = vmatprep.subr.bf16.mxu1 %v2684_v14 }
 0xd21   :  { %2566 = vmatpush3.bf16.msra.mxu1 %v2625_v53 }
 0xd22   :  { %2567 = vmatprep.subr.bf16.mxu1 %v2684_v14 }
 0xd25   :  { %2568 = vmatpush3.bf16.msra.mxu1 %v2626_v54 }
 0xd26   :  { %2569 = vmatprep.subr.bf16.mxu1 %v2684_v14 }
 0xd29   :  { %2570 = vmatpush3.bf16.msra.mxu1 %v2627_v8 }
 0xd2a   :  { %2571 = vmatprep.subr.bf16.mxu1 %v2684_v14 }
 0xd2d   :  { %2572 = vmatpush3.bf16.msra.mxu1 %v2628_v10  ;;  %v2291_v10 = vld [vmem:[%s3274_s17 + $0x2] sm:$0x3] }
 0xd2e   :  { %2573 = vmatprep.subr.bf16.mxu1 %v2684_v14 }
 0xd31   :  { %2574 = vmatpush3.bf16.msra.mxu1 %v2629_v41 }
 0xd32   :  { %2575 = vmatprep.subr.bf16.mxu1 %v2684_v14 }
 0xd35   :  { %2576 = vmatpush3.bf16.msra.mxu1 %v2630_v22 }
 0xd36   :  { %2577 = vmatprep.subr.bf16.mxu1 %v2684_v14 }
 0xd39   :  { %2578 = vmatpush3.bf16.msra.mxu1 %v2631_v23 }
 0xddc   :  { %v1760_v18 = vpop.f32.mrf.mxu1 }
 0xddd   :  { %v1761_v34 = vadd.f32 %v2251_v33, %v1760_v18 }
 0xdde   :  { %v2553_v35 = vpop.f32.mrf.mxu1 }
 0xddf   :  { %v1767_v36 = vadd.f32 %v1761_v34, %v3079_v20 }
 0xde0   :  { %v1763_v37 = vpop.f32.mrf.mxu1 }
 0xde1   :  { %v1764_v38 = vadd.f32 %v2251_v33, %v1763_v37  ;;  %v1771_v39 = vsel %vm195_vm2, %v1767_v36, 0.0 }
 0xde2   :  { %1772 = vadd.xlane.f32.xlu0 %v1771_v39  ;;  %v2554_v40 = vpop.f32.mrf.mxu1 }
 0xde3   :  { %v1768_v42 = vadd.f32 %v1764_v38, %v3081_v21  ;;  %v2622_v21 = vld [vmem:[%s3269_s13 + $0x18] sm:$0xff]  }
 0xde4   :  { %2556 = vmatpush3.bf16.msra.mxu0 %v2622_v21 }
 0xde5   :  { %v1774_v43 = vsel %vm195_vm2, %v1768_v42, 0.0  ;;  %2557 = vmatprep.subr.bf16.mxu0 %v2684_v14 }
 0xde6   :  { %1775 = vadd.xlane.f32.xlu1 %v1774_v43 }
 0xde8   :  { %2558 = vmatpush3.bf16.msra.mxu0 %v2623_v7 }
 0xde9   :  { %2583 = vmatprep.subr.bf16.mxu0 %v2684_v14 }
 0xe6b   :  { %v1773_v44 = vpop.xlane.xlu0 %1772 }
 0xe6c   :  { %v1777_v45 = vmul.f32 0.03125, %v1773_v44 }
 0xe6e   :  { %v1779_v46 = vsub.f32 %v1767_v36, %v1777_v45 }
 0xe6f   :  { %v1776_v47 = vpop.xlane.xlu1 %1775 }
 0xe70   :  { %v1778_v48 = vmul.f32 0.03125, %v1776_v47  ;;  %v1781_v49 = vmul.f32 %v1779_v46, %v1779_v46 }
 0xe72   :  { %v1780_v50 = vsub.f32 %v1768_v42, %v1778_v48  ;;  %v1783_v20 = vsel %vm195_vm2, %v1781_v49, 0.0 }
 0xe73   :  { %1784 = vadd.xlane.f32.xlu0 %v1783_v20 }
 0xe74   :  { %v1782_v51 = vmul.f32 %v1780_v50, %v1780_v50 }
 0xe76   :  { %v1786_v52 = vsel %vm195_vm2, %v1782_v51, 0.0  ;;  %v2632_v51 = vld [vmem:[%s3275_s18 + $0x8] sm:$0xff]  }
 0xe77   :  { %1787 = vadd.xlane.f32.xlu1 %v1786_v52  ;;  %v2633_v52 = vld [vmem:[%s3275_s18] sm:$0xff]  }
 0xefc   :  { %v1785_v55 = vpop.xlane.xlu0 %1784 }
 0xefd   :  { %v1789_v56 = vmul.f32 0.03125, %v1785_v55  ;;  %v2029_v55 = vrot.slane %v2291_v10, %v2869_v60 }
 0xeff   :  { %v1791_v57 = vadd.f32 1e-05, %v1789_v56 }
 0xf00   :  { %v1788_v58 = vpop.xlane.xlu1 %1787 }
 0xf01   :  { %2674 = vrsqrt.f32 %v1791_v57  ;;  %v1790_v59 = vmul.f32 0.03125, %v1788_v58 }
 0xf03   :  { %v1792_v61 = vadd.f32 1e-05, %v1790_v59 }
 0xf05   :  { %2676 = vrsqrt.f32 %v1792_v61 }
 0xf0e   :  { %v2675_v0 = vpop.eup %2674 }
 0xf0f   :  { %v1795_v1 = vmul.f32 %v2675_v0, %v1779_v46 }
 0xf11   :  { %v1801_v5 = vmul.f32 %v1800_v2, %v1795_v1 }
 0xf12   :  { %v2677_v3 = vpop.eup %2676 }
 0xf13   :  { %v1796_v4 = vmul.f32 %v2677_v3, %v1780_v50  ;;  %v1807_v12 = vadd.f32 %v1806_v6, %v1801_v5 }
 0xf15   :  { %v1802_v11 = vmul.f32 %v1800_v2, %v1796_v4 }
 0xf17   :  { %v1808_v13 = vadd.f32 %v1806_v6, %v1802_v11  ;;  %v2292_v6 = vld [vmem:[%s3276_s19] ss:$0 sm:$0xff] }
 0xf19   :  { %v1814_v19 = vpack.c.bf16 %v1808_v13, %v1807_v12 }
 0xf1b   :  { %2560 = vmatmul.mubr.msk.bf16.vlgmr.msra.gmra.mxu0 %vm195_vm2, %v1814_v19 }
 0xf1c   :  { %2587 = vmatprep.mubr.msk.bf16.mxu0 %vm2685_vm1, %v2684_v14  ;;  %2584 = vmatpush3.bf16.msra.mxu0 %v2632_v51 }
 0xf1d   :  { %2585 = vmatprep.subr.bf16.mxu0 %v2684_v14  ;;  %v2035_v14 = vrot.slane %v2291_v10, %v2875_v63 }
 0xf20   :  { %2586 = vmatpush3.bf16.msra.mxu0 %v2633_v52 }
 0xfdb   :  { %v1872_v25 = vpop.f32.mrf.mxu0 }
 0xfdc   :  { %v1873_v27 = vadd.f32 %v2261_v24, %v1872_v25 }
 0xfdd   :  { %v2561_v26 = vpop.f32.mrf.mxu0 }
 0xfde   :  { %v1879_v30 = vmax.f32 %v1873_v27, 0.0 }
 0xfdf   :  { %v1875_v28 = vpop.f32.mrf.mxu0 }
 0xfe0   :  { %v1876_v29 = vadd.f32 %v2261_v24, %v1875_v28  ;;  %v30_v28 = vstv %s3277_s22 }
 0xfe1   :  { %v2562_v15 = vpop.f32.mrf.mxu0  ;;  %31 = vst [vmem:[#allocation2] sm:$0x1] %v30_v28 }
 0xfe2   :  { %v1880_v16 = vmax.f32 %v1876_v29, 0.0 }
 0xfe4   :  { %v1898_v17 = vpack.c.bf16 %v1880_v16, %v1879_v30  ;;  %v2113_v16 = vld [vmem:[%s3278_s20] sm:$0x3] }
 0xfe6   :  { %2580 = vmatmul.mubr.bf16.vlgmr.msra.gmra.mxu1 %v1898_v17  ;;  %v2132_v17 = vrot.slane %v2113_v16, %v2869_v60 }
0x10a6   :  { %v1989_v32 = vpop.f32.mrf.mxu1 }
0x10a7   :  { %v1990_v33 = vadd.f32 %v2282_v31, %v1989_v32 }
0x10a8   :  { %v2581_v18 = vpop.f32.mrf.mxu1 }
0x10a9   :  { %v1996_v34 = vadd.f32 %v1990_v33, %v1807_v12  ;;  %v2137_v33 = vrot.slane %v2113_v16, %v2875_v63 }
0x10aa   :  { %v1992_v35 = vpop.f32.mrf.mxu1 }
0x10ab   :  { %v1993_v36 = vadd.f32 %v2282_v31, %v1992_v35  ;;  %v2000_v37 = vsel %vm195_vm2, %v1996_v34, 0.0  ;;  %v2296_v35 = vld [vmem:[%s3279_s21] ss:$0 sm:$0xff] }
0x10ac   :  { %2001 = vadd.xlane.f32.xlu0 %v2000_v37  ;;  %v2582_v38 = vpop.f32.mrf.mxu1 }
0x10ad   :  { %v1997_v39 = vadd.f32 %v1993_v36, %v1808_v13 }
0x10af   :  { %v2003_v40 = vsel %vm195_vm2, %v1997_v39, 0.0 }
0x10b0   :  { %2004 = vadd.xlane.f32.xlu1 %v2003_v40 }
0x1135   :  { %v2002_v42 = vpop.xlane.xlu0 %2001 }
0x1136   :  { %v2006_v43 = vmul.f32 0.03125, %v2002_v42 }
0x1138   :  { %v2008_v44 = vsub.f32 %v1996_v34, %v2006_v43 }
0x1139   :  { %v2005_v45 = vpop.xlane.xlu1 %2004 }
0x113a   :  { %v2007_v46 = vmul.f32 0.03125, %v2005_v45  ;;  %v2010_v47 = vmul.f32 %v2008_v44, %v2008_v44 }
0x113c   :  { %v2009_v48 = vsub.f32 %v1997_v39, %v2007_v46  ;;  %v2012_v49 = vsel %vm195_vm2, %v2010_v47, 0.0  ;;  %v2297_v39 = vld [vmem:[#allocation2] ss:$0 sm:$0xff] }
0x113d   :  { %2013 = vadd.xlane.f32.xlu0 %v2012_v49 }
0x113e   :  { %v2011_v50 = vmul.f32 %v2009_v48, %v2009_v48 }
0x1140   :  { %v2015_v20 = vsel %vm195_vm2, %v2011_v50, 0.0 }
0x1141   :  { %2016 = vadd.xlane.f32.xlu1 %v2015_v20 }
0x11c6   :  { %v2014_v21 = vpop.xlane.xlu0 %2013 }
0x11c7   :  { %v2018_v7 = vmul.f32 0.03125, %v2014_v21 }
0x11c9   :  { %v2020_v9 = vadd.f32 1e-05, %v2018_v7 }
0x11ca   :  { %v2017_v53 = vpop.xlane.xlu1 %2016 }
0x11cb   :  { %2678 = vrsqrt.f32 %v2020_v9  ;;  %v2019_v54 = vmul.f32 0.03125, %v2017_v53 }
0x11cd   :  { %v2021_v8 = vadd.f32 1e-05, %v2019_v54 }
0x11cf   :  { %2680 = vrsqrt.f32 %v2021_v8 }
0x11d8   :  { %v2679_v56 = vpop.eup %2678 }
0x11d9   :  { %v2024_v57 = vmul.f32 %v2679_v56, %v2008_v44 }
0x11db   :  { %v2030_v58 = vmul.f32 %v2029_v55, %v2024_v57 }
0x11dc   :  { %v2681_v59 = vpop.eup %2680 }
0x11dd   :  { %v2025_v61 = vmul.f32 %v2681_v59, %v2009_v48  ;;  %v2036_v0 = vadd.f32 %v2035_v14, %v2030_v58 }
0x11df   :  { %v2031_v62 = vmul.f32 %v2029_v55, %v2025_v61  ;;  %v2039_v2 = vrot.slane %v2036_v0, 7 }
0x11e1   :  { %v2037_v1 = vadd.f32 %v2035_v14, %v2031_v62 }
0x11e3   :  { %v2042_v3 = vrot.slane %v2037_v1, 6 }
0x11e5   :  { %v2045_v4 = vsel %vm2044_vm5, %v2039_v2, %v2042_v3 }
0x11e6   :  { %v2050_v5 = vpack.c.bf16 %v2045_v4, %v2045_v4 }
0x11e8   :  { %2588 = vmatmul.mubr.msk.bf16.vlgmr.msra.gmra.mxu0 %vm195_vm2, %v2050_v5 }
0x12a8   :  { %v2107_v11 = vpop.f32.mrf.mxu0 }
0x12a9   :  { %v2108_v12 = vadd.f32 %v2292_v6, %v2107_v11 }
0x12aa   :  { %v2589_v13 = vpop.f32.mrf.mxu0 }
0x12ab   :  { %v2115_v19 = vsel %vm2114_vm6, %v2108_v12, 0.0 }
0x12ac   :  { %2116 = vadd.xlane.f32.xlu0 %v2115_v19  ;;  %v2110_v41 = vpop.f32.mrf.mxu0 }
0x12ae   :  { %v2590_v22 = vpop.f32.mrf.mxu0 }
0x1335   :  { %v2117_v23 = vpop.xlane.xlu0 %2116 }
0x1336   :  { %v2119_v24 = vmul.f32 0.0625, %v2117_v23 }
0x1338   :  { %v2120_v25 = vsub.f32 %v2108_v12, %v2119_v24 }
0x133a   :  { %v2121_v26 = vmul.f32 %v2120_v25, %v2120_v25 }
0x133c   :  { %v2122_v27 = vsel %vm2114_vm6, %v2121_v26, 0.0 }
0x133d   :  { %2123 = vadd.xlane.f32.xlu1 %v2122_v27 }
0x13c6   :  { %v2124_v29 = vpop.xlane.xlu1 %2123 }
0x13c7   :  { %v2125_v15 = vmul.f32 0.0625, %v2124_v29 }
0x13c9   :  { %v2126_v30 = vadd.f32 1e-05, %v2125_v15 }
0x13cb   :  { %2682 = vrsqrt.f32 %v2126_v30 }
0x13d8   :  { %v2683_v31 = vpop.eup %2682 }
0x13d9   :  { %v2128_v32 = vmul.f32 %v2683_v31, %v2120_v25 }
0x13db   :  { %v2133_v18 = vmul.f32 %v2132_v17, %v2128_v32 }
0x13dd   :  { %v2138_v34 = vadd.f32 %v2137_v33, %v2133_v18 }
0x13df   :  { %v2139_v36 = vmax.f32 %v2138_v34, 0.0 }
0x13e1   :  { %v2147_v37 = vmul.f32 %v2296_v35, %v2139_v36 }
0x13e3   :  { %v2148_v38 = vsel %vm2114_vm6, %v2147_v37, 0.0 }
0x13e4   :  { %2149 = vadd.xlane.f32.xlu0 %v2148_v38 }
0x146d   :  { %v2150_v40 = vpop.xlane.xlu0 %2149 }
0x146e   :  { %v2158_v42 = vadd.f32 %v2297_v39, %v2150_v40 }
0x1470   :  { %2160 = vst.msk [vmem:[%s3280_s25] sm:$0x3] %vm2159_vm7, %v2158_v42 }

</bundles_post_ra>
